<compile_context>
chip_gen: v7x
topology: tpu7x:2x2x1
jax: 0.10.0
libtpu: 0.0.40
codegen_flags: <defaults>
</compile_context>

<pallas_src>
import numpy as np
import jax
import jax.numpy as jnp
from jax.experimental import pallas as pl
from jax.experimental.pallas import tpu as pltpu


# -----------------------------------------------------------------------------
# Fused kernel: processes one image end-to-end, entirely in VMEM.
# -----------------------------------------------------------------------------
def fused_cnn_kernel(x_ref,
                     w1_ref, b1_ref, w2_ref, b2_ref,
                     fc1w_ref, fc1b_ref, fc2w_ref, fc2b_ref,
                     o_ref,
                     pad1_ref, slab1_ref, pad2_ref, slab2_ref, flat_ref):
    f32 = jnp.float32
    C, H, W = x_ref.shape[1], x_ref.shape[2], x_ref.shape[3]

    # ---------------- conv1 + relu + maxpool2 : ONE matmul ----------------
    kpad1 = pad1_ref.shape[1]                      # 128 (C*W = 96 padded to a lane multiple)
    kh1 = slab1_ref.shape[1] // kpad1              # 3
    ph1 = (pad1_ref.shape[0] - H) // 2             # 1
    L1 = w1_ref.shape[1] // 2                      # 128 = (W//2) * Cout1

    # Zero once: covers both height-halo rows and the K-pad lanes [96:128).
    pad1_ref[...] = jnp.zeros(pad1_ref.shape, f32)
    for c in range(C):                             # NCHW channel planes -> (c*W + w) lanes
        pad1_ref[ph1:ph1 + H, c * W:(c + 1) * W] = x_ref[0, c]
    for kh in range(kh1):                          # fold the kh taps into the contraction dim
        slab1_ref[:, kh * kpad1:(kh + 1) * kpad1] = pad1_ref[kh:kh + H, :]

    acc1 = jnp.dot(slab1_ref[...], w1_ref[...], preferred_element_type=f32)   # (H, 2*L1)
    cm1 = jnp.maximum(acc1[:, :L1], acc1[:, L1:])                 # width 2x pool (aligned halves)
    pm1 = jnp.max(cm1.reshape(H // 2, 2, L1), axis=1)             # height 2x pool
    p1 = jnp.maximum(pm1 + b1_ref[...], 0.0)                      # bias + ReLU once, post-pool

    # ---------------- conv2 + relu + maxpool2 : ONE matmul ----------------
    H2 = H // 2
    kpad2 = pad2_ref.shape[1]                      # 128 = (W//2) * Cout1
    kh2 = slab2_ref.shape[1] // kpad2              # 3
    ph2 = (pad2_ref.shape[0] - H2) // 2            # 1
    L2 = w2_ref.shape[1] // 2                      # 128 = (W//4) * Cout2

    pad2_ref[0:ph2, :] = jnp.zeros((ph2, kpad2), f32)             # zero halo rows only
    pad2_ref[ph2 + H2:, :] = jnp.zeros((ph2, kpad2), f32)
    pad2_ref[ph2:ph2 + H2, :] = p1                                # interior fully overwritten
    for kh in range(kh2):
        slab2_ref[:, kh * kpad2:(kh + 1) * kpad2] = pad2_ref[kh:kh + H2, :]

    acc2 = jnp.dot(slab2_ref[...], w2_ref[...], preferred_element_type=f32)   # (H2, 2*L2)
    cm2 = jnp.maximum(acc2[:, :L2], acc2[:, L2:])
    pm2 = jnp.max(cm2.reshape(H2 // 2, 2, L2), axis=1)
    p2 = jnp.maximum(pm2 + b2_ref[...], 0.0)                      # (H2//2, L2) = (8, 128)

    # ---------------- fc1 (single K=1024 matmul) -> relu -> fc2 -> softmax ----------------
    H3 = H2 // 2
    for r in range(H3):                            # HWC flatten via lane-aligned (1,128) stores
        flat_ref[0:1, r * L2:(r + 1) * L2] = p2[r:r + 1, :]
    h1 = jnp.dot(flat_ref[...], fc1w_ref[...], preferred_element_type=f32) + fc1b_ref[...]
    h1 = jnp.maximum(h1, 0.0)                                     # (1, 64)

    logits = jnp.dot(h1, fc2w_ref[...], preferred_element_type=f32) + fc2b_ref[...]
    m = jnp.max(logits, axis=-1, keepdims=True)
    e = jnp.exp(logits - m)
    probs = e / jnp.sum(e, axis=-1, keepdims=True)
    o_ref[...] = probs[None].astype(o_ref.dtype)                  # (1, 1, 10)


# -----------------------------------------------------------------------------
# Wrapper: one pallas_call for the whole forward pass. Input stays NCHW (no
# wrapper-side transpose).
# -----------------------------------------------------------------------------
def custom_cnn_forward(x_nchw, kparams):
    N, C, H, W = x_nchw.shape
    conv1, conv2 = kparams["conv"]
    w1, b1, kpad1, kh1 = conv1["w"], conv1["b"], conv1["kpad"], conv1["kh"]
    w2, b2, kpad2, kh2 = conv2["w"], conv2["b"], conv2["kpad"], conv2["kh"]
    fc1w, fc1b = kparams["fc1"]
    fc2w, fc2b = kparams["fc2"]
    O = fc2w.shape[1]
    H2 = H // 2
    H3 = H2 // 2
    L2 = w2.shape[1] // 2

    def full(arr):
        shape = arr.shape
        return pl.BlockSpec(shape, lambda n: (0,) * len(shape))

    out = pl.pallas_call(
        fused_cnn_kernel,
        out_shape=jax.ShapeDtypeStruct((N, 1, O), jnp.float32),
        grid=(N,),
        in_specs=[
            pl.BlockSpec((1, C, H, W), lambda n: (n, 0, 0, 0)),
            full(w1), full(b1), full(w2), full(b2),
            full(fc1w), full(fc1b), full(fc2w), full(fc2b),
        ],
        out_specs=pl.BlockSpec((1, 1, O), lambda n: (n, 0, 0)),
        scratch_shapes=[
            pltpu.VMEM((H + 2 * (kh1 // 2), kpad1), jnp.float32),    # padded layer-1 input
            pltpu.VMEM((H, kh1 * kpad1), jnp.float32),               # layer-1 K-folded slab
            pltpu.VMEM((H2 + 2 * (kh2 // 2), kpad2), jnp.float32),   # padded layer-2 input
            pltpu.VMEM((H2, kh2 * kpad2), jnp.float32),              # layer-2 K-folded slab
            pltpu.VMEM((1, H3 * L2), jnp.float32),                   # fc1 flattened input
        ],
        compiler_params=pltpu.CompilerParams(
            dimension_semantics=("parallel",)),      # batch -> one image per TC on v7x
    )(x_nchw, w1, b1, w2, b2, fc1w, fc1b, fc2w, fc2b)
    return out.reshape(N, O)


# -----------------------------------------------------------------------------
# Parameter conversion (one-time, host-side): K-folded + N-concatenated banded
# conv weights, tiled conv biases, HWC-permuted/flattened fc1.
# -----------------------------------------------------------------------------
def _banded_conv_weights(w_oihw, width, k_order, kpad):
    """Banded conv weights with kh taps folded into K and even/odd output parities
    concatenated along N.

    Returns (KH*kpad, 2 * (width//2) * Cout) float32 with
      row  index: kh*kpad + (c*width + u)  if k_order == "cw"   (layer 1: raw NCHW planes)
                  kh*kpad + (u*cin  + c)   if k_order == "wc"   (pooled activations)
      col  index: parity*Lout + wo*Cout + co,  Lout = (width//2)*Cout
      value     : W[co, c, kh, kw]  with u = 2*wo + parity + kw - KW//2
                  (taps with u outside [0, width) are dropped -> folded zero width-pad)
    """
    w = np.asarray(w_oihw, np.float32)              # (Cout, Cin, KH, KW)
    cout, cin, khn, kwn = w.shape
    pad = kwn // 2
    wo_n = width // 2
    lout = wo_n * cout
    mat = np.zeros((khn * kpad, 2 * lout), np.float32)
    for kh in range(khn):
        for kw in range(kwn):
            for parity in range(2):
                for wo in range(wo_n):
                    u = 2 * wo + parity + kw - pad
                    if not (0 <= u < width):
                        continue
                    for c in range(cin):
                        k = c * width + u if k_order == "cw" else u * cin + c
                        col = parity * lout + wo * cout
                        mat[kh * kpad + k, col:col + cout] = w[:, c, kh, kw]
    return mat


def convert_params(params, image_hw=32):
    width = image_hw
    conv_k = []
    k_order = "cw"                                   # layer 1 eats raw NCHW channel planes
    for (w_oihw, b) in params["conv"]:
        w_np = np.asarray(w_oihw, np.float32)
        cin, khn = w_np.shape[1], w_np.shape[2]
        kraw = width * cin
        kpad = ((kraw + 127) // 128) * 128
        mat = _banded_conv_weights(w_np, width, k_order, kpad)
        b_tiled = np.tile(np.asarray(b, np.float32), width // 2)[None, :]   # (1, Wo*Cout)
        conv_k.append({"w": jnp.asarray(mat), "b": jnp.asarray(b_tiled),
                       "kpad": kpad, "kh": khn})
        width //= 2
        k_order = "wc"                               # pooled activations are (w*Cout + co)

    c_last = np.asarray(params["conv"][-1][0]).shape[0]
    h2 = w2 = width                                  # spatial size after all pools
    fc1_w, fc1_b = params["fc1"]                     # (hidden, C*H*W) CHW flatten, (hidden,)
    fc1_w = np.asarray(fc1_w, np.float32)
    hidden = fc1_w.shape[0]
    # Permute rows from PyTorch's CHW flatten order to the kernel's (h, w*C + c) order,
    # then flatten to (H*W*C, hidden) so fc1 is a single K=H*W*C matmul.
    fc1_k = (fc1_w.T.reshape(c_last, h2, w2, hidden)
             .transpose(1, 2, 0, 3)
             .reshape(h2 * w2 * c_last, hidden))
    fc2_w, fc2_b = params["fc2"]
    return {
        "conv": conv_k,
        "fc1": (jnp.asarray(fc1_k), jnp.asarray(np.asarray(fc1_b, np.float32))[None, :]),
        "fc2": (jnp.asarray(np.asarray(fc2_w, np.float32).T),
                jnp.asarray(np.asarray(fc2_b, np.float32))[None, :]),
    }


# -----------------------------------------------------------------------------
# Pure-JAX reference (PyTorch semantics) + parameter init (PyTorch conventions)
# -----------------------------------------------------------------------------
def reference_forward(x_nchw, params):
    x = x_nchw
    for (w, b) in params["conv"]:
        pad = w.shape[-1] // 2
        x = jax.lax.conv_general_dilated(
            x, w, window_strides=(1, 1), padding=[(pad, pad), (pad, pad)],
            dimension_numbers=("NCHW", "OIHW", "NCHW"))
        x = jnp.maximum(x + b[None, :, None, None], 0.0)
        x = jax.lax.reduce_window(x, -jnp.inf, jax.lax.max,
                                  (1, 1, 2, 2), (1, 1, 2, 2), "VALID")
    x = x.reshape(x.shape[0], -1)
    w1, b1 = params["fc1"]
    w2, b2 = params["fc2"]
    x = jnp.maximum(x @ w1.T + b1, 0.0)
    logits = x @ w2.T + b2
    return jax.nn.softmax(logits, axis=-1)


def init_params(key, num_filters=(8, 16), filter_sizes=(3, 3)):
    keys = jax.random.split(key, 2 * len(num_filters) + 4)
    params = {"conv": []}
    in_ch = 3
    ki = 0
    for nf, fs in zip(num_filters, filter_sizes):
        w = 0.1 * jax.random.normal(keys[ki], (nf, in_ch, fs, fs), jnp.float32)
        b = 0.01 * jax.random.normal(keys[ki + 1], (nf,), jnp.float32)
        params["conv"].append((w, b))
        in_ch = nf
        ki += 2
    num_flat = num_filters[-1] * (32 // 2 ** len(num_filters)) ** 2
    params["fc1"] = (0.05 * jax.random.normal(keys[ki], (64, num_flat), jnp.float32),
                     0.01 * jax.random.normal(keys[ki + 1], (64,), jnp.float32))
    params["fc2"] = (0.05 * jax.random.normal(keys[ki + 2], (10, 64), jnp.float32),
                     0.01 * jax.random.normal(keys[ki + 3], (10,), jnp.float32))
    return params


if __name__ == "__main__":
    # TODO(synk): dropout_rates are 0.0; with p=0 PyTorch adds no Dropout module, so nothing
    # is emitted (p>0 in train mode would need an in-kernel pltpu.prng_* mask).
    key = jax.random.PRNGKey(0)
    k_params, k_x = jax.random.split(key)
    params = init_params(k_params)
    kparams = convert_params(params, image_hw=32)

    # Input: batch=2, 3x32x32 (NCHW, exactly as the PyTorch module expects).
    x = jax.random.normal(k_x, (2, 3, 32, 32), jnp.float32)

    probs = custom_cnn_forward(x, kparams)
    probs = jax.block_until_ready(probs)

    ref = jax.block_until_ready(reference_forward(x, params))

    assert probs.shape == (2, 10), probs.shape
    assert bool(jnp.all(jnp.isfinite(probs)))
    assert bool(jnp.allclose(jnp.sum(probs, axis=1), 1.0, atol=1e-5)), jnp.sum(probs, axis=1)
    assert bool(jnp.allclose(probs, ref, atol=2e-3)), float(jnp.max(jnp.abs(probs - ref)))
    print("KERNEL_OK")
</pallas_src>

<mosaic_0001>
module attributes {stable_mosaic.version = 11 : i64} {
  func.func @fused_cnn_kernel(%arg0: i32, %arg1: memref<1x3x32x32xf32, #tpu.memory_space<vmem>>, %arg2: memref<384x256xf32, #tpu.memory_space<vmem>>, %arg3: memref<1x128xf32, #tpu.memory_space<vmem>>, %arg4: memref<384x256xf32, #tpu.memory_space<vmem>>, %arg5: memref<1x128xf32, #tpu.memory_space<vmem>>, %arg6: memref<1024x64xf32, #tpu.memory_space<vmem>>, %arg7: memref<1x64xf32, #tpu.memory_space<vmem>>, %arg8: memref<64x10xf32, #tpu.memory_space<vmem>>, %arg9: memref<1x10xf32, #tpu.memory_space<vmem>>, %arg10: memref<1x1x10xf32, #tpu.memory_space<vmem>>, %arg11: memref<34x128xf32, #tpu.memory_space<vmem>>, %arg12: memref<32x384xf32, #tpu.memory_space<vmem>>, %arg13: memref<18x128xf32, #tpu.memory_space<vmem>>, %arg14: memref<16x384xf32, #tpu.memory_space<vmem>>, %arg15: memref<1x1024xf32, #tpu.memory_space<vmem>>) attributes {dimension_semantics = [#tpu.dimension_semantics<parallel>], iteration_bounds = array<i64: 2>, scalar_prefetch = 0 : i64, scratch_operands = 5 : i64, tpu.core_type = #tpu.core_type<tc>, window_params = [{transform_indices = @transform_0, window_bounds = array<i64: 1, 3, 32, 32>}, {pipeline_mode = #tpu.pipeline_mode<synchronous>, transform_indices = @transform_1, window_bounds = array<i64: 384, 256>}, {pipeline_mode = #tpu.pipeline_mode<synchronous>, transform_indices = @transform_2, window_bounds = array<i64: 1, 128>}, {pipeline_mode = #tpu.pipeline_mode<synchronous>, transform_indices = @transform_3, window_bounds = array<i64: 384, 256>}, {pipeline_mode = #tpu.pipeline_mode<synchronous>, transform_indices = @transform_4, window_bounds = array<i64: 1, 128>}, {pipeline_mode = #tpu.pipeline_mode<synchronous>, transform_indices = @transform_5, window_bounds = array<i64: 1024, 64>}, {pipeline_mode = #tpu.pipeline_mode<synchronous>, transform_indices = @transform_6, window_bounds = array<i64: 1, 64>}, {pipeline_mode = #tpu.pipeline_mode<synchronous>, transform_indices = @transform_7, window_bounds = array<i64: 64, 10>}, {pipeline_mode = #tpu.pipeline_mode<synchronous>, transform_indices = @transform_8, window_bounds = array<i64: 1, 10>}, {transform_indices = @transform_9, window_bounds = array<i64: 1, 1, 10>}]} {
    %cst = arith.constant 0.000000e+00 : f32
    %0 = vector.broadcast %cst : f32 to vector<34x128xf32>
    %c0 = arith.constant 0 : index
    %c0_0 = arith.constant 0 : index
    %1 = vector.load %arg11[%c0, %c0_0] : memref<34x128xf32, #tpu.memory_space<vmem>>, vector<34x128xf32>
    tpu.vector_store %arg11[%c0, %c0_0], %0 {strides = array<i32>} : memref<34x128xf32, #tpu.memory_space<vmem>>, vector<34x128xf32>,
    %c0_1 = arith.constant 0 : index
    %c0_2 = arith.constant 0 : index
    %c0_3 = arith.constant 0 : index
    %c0_4 = arith.constant 0 : index
    %2 = vector.load %arg1[%c0_1, %c0_2, %c0_3, %c0_4] : memref<1x3x32x32xf32, #tpu.memory_space<vmem>>, vector<1x1x32x32xf32>
    %3 = vector.shape_cast %2 : vector<1x1x32x32xf32> to vector<32x32xf32>
    %c1 = arith.constant 1 : index
    %c0_5 = arith.constant 0 : index
    %4 = vector.load %arg11[%c1, %c0_5] : memref<34x128xf32, #tpu.memory_space<vmem>>, vector<32x32xf32>
    tpu.vector_store %arg11[%c1, %c0_5], %3 {strides = array<i32>} : memref<34x128xf32, #tpu.memory_space<vmem>>, vector<32x32xf32>,
    %c0_6 = arith.constant 0 : index
    %c1_7 = arith.constant 1 : index
    %c0_8 = arith.constant 0 : index
    %c0_9 = arith.constant 0 : index
    %5 = vector.load %arg1[%c0_6, %c1_7, %c0_8, %c0_9] : memref<1x3x32x32xf32, #tpu.memory_space<vmem>>, vector<1x1x32x32xf32>
    %6 = vector.shape_cast %5 : vector<1x1x32x32xf32> to vector<32x32xf32>
    %c1_10 = arith.constant 1 : index
    %c32 = arith.constant 32 : index
    %7 = vector.load %arg11[%c1_10, %c32] : memref<34x128xf32, #tpu.memory_space<vmem>>, vector<32x32xf32>
    tpu.vector_store %arg11[%c1_10, %c32], %6 {strides = array<i32>} : memref<34x128xf32, #tpu.memory_space<vmem>>, vector<32x32xf32>,
    %c0_11 = arith.constant 0 : index
    %c2 = arith.constant 2 : index
    %c0_12 = arith.constant 0 : index
    %c0_13 = arith.constant 0 : index
    %8 = vector.load %arg1[%c0_11, %c2, %c0_12, %c0_13] : memref<1x3x32x32xf32, #tpu.memory_space<vmem>>, vector<1x1x32x32xf32>
    %9 = vector.shape_cast %8 : vector<1x1x32x32xf32> to vector<32x32xf32>
    %c1_14 = arith.constant 1 : index
    %c64 = arith.constant 64 : index
    %10 = vector.load %arg11[%c1_14, %c64] : memref<34x128xf32, #tpu.memory_space<vmem>>, vector<32x32xf32>
    tpu.vector_store %arg11[%c1_14, %c64], %9 {strides = array<i32>} : memref<34x128xf32, #tpu.memory_space<vmem>>, vector<32x32xf32>,
    %c0_15 = arith.constant 0 : index
    %c0_16 = arith.constant 0 : index
    %11 = vector.load %arg11[%c0_15, %c0_16] : memref<34x128xf32, #tpu.memory_space<vmem>>, vector<32x128xf32>
    %c0_17 = arith.constant 0 : index
    %c0_18 = arith.constant 0 : index
    %12 = vector.load %arg12[%c0_17, %c0_18] : memref<32x384xf32, #tpu.memory_space<vmem>>, vector<32x128xf32>
    tpu.vector_store %arg12[%c0_17, %c0_18], %11 {strides = array<i32>} : memref<32x384xf32, #tpu.memory_space<vmem>>, vector<32x128xf32>,
    %c1_19 = arith.constant 1 : index
    %c0_20 = arith.constant 0 : index
    %13 = vector.load %arg11[%c1_19, %c0_20] : memref<34x128xf32, #tpu.memory_space<vmem>>, vector<32x128xf32>
    %c0_21 = arith.constant 0 : index
    %c128 = arith.constant 128 : index
    %14 = vector.load %arg12[%c0_21, %c128] : memref<32x384xf32, #tpu.memory_space<vmem>>, vector<32x128xf32>
    tpu.vector_store %arg12[%c0_21, %c128], %13 {strides = array<i32>} : memref<32x384xf32, #tpu.memory_space<vmem>>, vector<32x128xf32>,
    %c2_22 = arith.constant 2 : index
    %c0_23 = arith.constant 0 : index
    %15 = vector.load %arg11[%c2_22, %c0_23] : memref<34x128xf32, #tpu.memory_space<vmem>>, vector<32x128xf32>
    %c0_24 = arith.constant 0 : index
    %c256 = arith.constant 256 : index
    %16 = vector.load %arg12[%c0_24, %c256] : memref<32x384xf32, #tpu.memory_space<vmem>>, vector<32x128xf32>
    tpu.vector_store %arg12[%c0_24, %c256], %15 {strides = array<i32>} : memref<32x384xf32, #tpu.memory_space<vmem>>, vector<32x128xf32>,
    %c0_25 = arith.constant 0 : index
    %c0_26 = arith.constant 0 : index
    %17 = vector.load %arg12[%c0_25, %c0_26] : memref<32x384xf32, #tpu.memory_space<vmem>>, vector<32x384xf32>
    %c0_27 = arith.constant 0 : index
    %c0_28 = arith.constant 0 : index
    %18 = vector.load %arg2[%c0_27, %c0_28] : memref<384x256xf32, #tpu.memory_space<vmem>>, vector<384x256xf32>
    %cst_29 = arith.constant dense<0.000000e+00> : vector<32x256xf32>
    %19 = tpu.matmul %17, %18, %cst_29 {dimension_numbers = #tpu.dot_dimension_numbers<[1], [0], [0], [1], [0, 0, 1, 1], [], []>} : vector<32x384xf32>, vector<384x256xf32>, vector<32x256xf32> -> vector<32x256xf32>
    %20 = vector.extract_strided_slice %19 {offsets = [0, 0], sizes = [32, 128], strides = [1, 1]} : vector<32x256xf32> to vector<32x128xf32>
    %21 = vector.extract_strided_slice %19 {offsets = [0, 128], sizes = [32, 128], strides = [1, 1]} : vector<32x256xf32> to vector<32x128xf32>
    %22 = arith.maximumf %20, %21 : vector<32x128xf32>
    %23 = vector.shape_cast %22 : vector<32x128xf32> to vector<16x2x128xf32>
    %cst_30 = arith.constant dense<0xFF800000> : vector<16x128xf32>
    %24 = vector.multi_reduction <maximumf>, %23, %cst_30 [1] : vector<16x2x128xf32> to vector<16x128xf32>
    %c0_31 = arith.constant 0 : index
    %c0_32 = arith.constant 0 : index
    %25 = vector.load %arg3[%c0_31, %c0_32] : memref<1x128xf32, #tpu.memory_space<vmem>>, vector<1x128xf32>
    %26 = vector.broadcast %25 : vector<1x128xf32> to vector<16x128xf32>
    %27 = arith.addf %24, %26 : vector<16x128xf32>
    %cst_33 = arith.constant 0.000000e+00 : f32
    %28 = vector.broadcast %cst_33 : f32 to vector<16x128xf32>
    %29 = arith.maximumf %27, %28 : vector<16x128xf32>
    %cst_34 = arith.constant 0.000000e+00 : f32
    %30 = vector.broadcast %cst_34 : f32 to vector<1x128xf32>
    %c0_35 = arith.constant 0 : index
    %c0_36 = arith.constant 0 : index
    %31 = vector.load %arg13[%c0_35, %c0_36] : memref<18x128xf32, #tpu.memory_space<vmem>>, vector<1x128xf32>
    tpu.vector_store %arg13[%c0_35, %c0_36], %30 {strides = array<i32>} : memref<18x128xf32, #tpu.memory_space<vmem>>, vector<1x128xf32>,
    %cst_37 = arith.constant 0.000000e+00 : f32
    %32 = vector.broadcast %cst_37 : f32 to vector<1x128xf32>
    %c17 = arith.constant 17 : index
    %c0_38 = arith.constant 0 : index
    %33 = vector.load %arg13[%c17, %c0_38] : memref<18x128xf32, #tpu.memory_space<vmem>>, vector<1x128xf32>
    tpu.vector_store %arg13[%c17, %c0_38], %32 {strides = array<i32>} : memref<18x128xf32, #tpu.memory_space<vmem>>, vector<1x128xf32>,
    %c1_39 = arith.constant 1 : index
    %c0_40 = arith.constant 0 : index
    %34 = vector.load %arg13[%c1_39, %c0_40] : memref<18x128xf32, #tpu.memory_space<vmem>>, vector<16x128xf32>
    tpu.vector_store %arg13[%c1_39, %c0_40], %29 {strides = array<i32>} : memref<18x128xf32, #tpu.memory_space<vmem>>, vector<16x128xf32>,
    %c0_41 = arith.constant 0 : index
    %c0_42 = arith.constant 0 : index
    %35 = vector.load %arg13[%c0_41, %c0_42] : memref<18x128xf32, #tpu.memory_space<vmem>>, vector<16x128xf32>
    %c0_43 = arith.constant 0 : index
    %c0_44 = arith.constant 0 : index
    %36 = vector.load %arg14[%c0_43, %c0_44] : memref<16x384xf32, #tpu.memory_space<vmem>>, vector<16x128xf32>
    tpu.vector_store %arg14[%c0_43, %c0_44], %35 {strides = array<i32>} : memref<16x384xf32, #tpu.memory_space<vmem>>, vector<16x128xf32>,
    %c1_45 = arith.constant 1 : index
    %c0_46 = arith.constant 0 : index
    %37 = vector.load %arg13[%c1_45, %c0_46] : memref<18x128xf32, #tpu.memory_space<vmem>>, vector<16x128xf32>
    %c0_47 = arith.constant 0 : index
    %c128_48 = arith.constant 128 : index
    %38 = vector.load %arg14[%c0_47, %c128_48] : memref<16x384xf32, #tpu.memory_space<vmem>>, vector<16x128xf32>
    tpu.vector_store %arg14[%c0_47, %c128_48], %37 {strides = array<i32>} : memref<16x384xf32, #tpu.memory_space<vmem>>, vector<16x128xf32>,
    %c2_49 = arith.constant 2 : index
    %c0_50 = arith.constant 0 : index
    %39 = vector.load %arg13[%c2_49, %c0_50] : memref<18x128xf32, #tpu.memory_space<vmem>>, vector<16x128xf32>
    %c0_51 = arith.constant 0 : index
    %c256_52 = arith.constant 256 : index
    %40 = vector.load %arg14[%c0_51, %c256_52] : memref<16x384xf32, #tpu.memory_space<vmem>>, vector<16x128xf32>
    tpu.vector_store %arg14[%c0_51, %c256_52], %39 {strides = array<i32>} : memref<16x384xf32, #tpu.memory_space<vmem>>, vector<16x128xf32>,
    %c0_53 = arith.constant 0 : index
    %c0_54 = arith.constant 0 : index
    %41 = vector.load %arg14[%c0_53, %c0_54] : memref<16x384xf32, #tpu.memory_space<vmem>>, vector<16x384xf32>
    %c0_55 = arith.constant 0 : index
    %c0_56 = arith.constant 0 : index
    %42 = vector.load %arg4[%c0_55, %c0_56] : memref<384x256xf32, #tpu.memory_space<vmem>>, vector<384x256xf32>
    %cst_57 = arith.constant dense<0.000000e+00> : vector<16x256xf32>
    %43 = tpu.matmul %41, %42, %cst_57 {dimension_numbers = #tpu.dot_dimension_numbers<[1], [0], [0], [1], [0, 0, 1, 1], [], []>} : vector<16x384xf32>, vector<384x256xf32>, vector<16x256xf32> -> vector<16x256xf32>
    %44 = vector.extract_strided_slice %43 {offsets = [0, 0], sizes = [16, 128], strides = [1, 1]} : vector<16x256xf32> to vector<16x128xf32>
    %45 = vector.extract_strided_slice %43 {offsets = [0, 128], sizes = [16, 128], strides = [1, 1]} : vector<16x256xf32> to vector<16x128xf32>
    %46 = arith.maximumf %44, %45 : vector<16x128xf32>
    %47 = vector.shape_cast %46 : vector<16x128xf32> to vector<8x2x128xf32>
    %cst_58 = arith.constant dense<0xFF800000> : vector<8x128xf32>
    %48 = vector.multi_reduction <maximumf>, %47, %cst_58 [1] : vector<8x2x128xf32> to vector<8x128xf32>
    %c0_59 = arith.constant 0 : index
    %c0_60 = arith.constant 0 : index
    %49 = vector.load %arg5[%c0_59, %c0_60] : memref<1x128xf32, #tpu.memory_space<vmem>>, vector<1x128xf32>
    %50 = vector.broadcast %49 : vector<1x128xf32> to vector<8x128xf32>
    %51 = arith.addf %48, %50 : vector<8x128xf32>
    %cst_61 = arith.constant 0.000000e+00 : f32
    %52 = vector.broadcast %cst_61 : f32 to vector<8x128xf32>
    %53 = arith.maximumf %51, %52 : vector<8x128xf32>
    %54 = vector.extract_strided_slice %53 {offsets = [0, 0], sizes = [1, 128], strides = [1, 1]} : vector<8x128xf32> to vector<1x128xf32>
    %c0_62 = arith.constant 0 : index
    %c0_63 = arith.constant 0 : index
    %55 = vector.load %arg15[%c0_62, %c0_63] : memref<1x1024xf32, #tpu.memory_space<vmem>>, vector<1x128xf32>
    tpu.vector_store %arg15[%c0_62, %c0_63], %54 {strides = array<i32>} : memref<1x1024xf32, #tpu.memory_space<vmem>>, vector<1x128xf32>,
    %56 = vector.extract_strided_slice %53 {offsets = [1, 0], sizes = [1, 128], strides = [1, 1]} : vector<8x128xf32> to vector<1x128xf32>
    %c0_64 = arith.constant 0 : index
    %c128_65 = arith.constant 128 : index
    %57 = vector.load %arg15[%c0_64, %c128_65] : memref<1x1024xf32, #tpu.memory_space<vmem>>, vector<1x128xf32>
    tpu.vector_store %arg15[%c0_64, %c128_65], %56 {strides = array<i32>} : memref<1x1024xf32, #tpu.memory_space<vmem>>, vector<1x128xf32>,
    %58 = vector.extract_strided_slice %53 {offsets = [2, 0], sizes = [1, 128], strides = [1, 1]} : vector<8x128xf32> to vector<1x128xf32>
    %c0_66 = arith.constant 0 : index
    %c256_67 = arith.constant 256 : index
    %59 = vector.load %arg15[%c0_66, %c256_67] : memref<1x1024xf32, #tpu.memory_space<vmem>>, vector<1x128xf32>
    tpu.vector_store %arg15[%c0_66, %c256_67], %58 {strides = array<i32>} : memref<1x1024xf32, #tpu.memory_space<vmem>>, vector<1x128xf32>,
    %60 = vector.extract_strided_slice %53 {offsets = [3, 0], sizes = [1, 128], strides = [1, 1]} : vector<8x128xf32> to vector<1x128xf32>
    %c0_68 = arith.constant 0 : index
    %c384 = arith.constant 384 : index
    %61 = vector.load %arg15[%c0_68, %c384] : memref<1x1024xf32, #tpu.memory_space<vmem>>, vector<1x128xf32>
    tpu.vector_store %arg15[%c0_68, %c384], %60 {strides = array<i32>} : memref<1x1024xf32, #tpu.memory_space<vmem>>, vector<1x128xf32>,
    %62 = vector.extract_strided_slice %53 {offsets = [4, 0], sizes = [1, 128], strides = [1, 1]} : vector<8x128xf32> to vector<1x128xf32>
    %c0_69 = arith.constant 0 : index
    %c512 = arith.constant 512 : index
    %63 = vector.load %arg15[%c0_69, %c512] : memref<1x1024xf32, #tpu.memory_space<vmem>>, vector<1x128xf32>
    tpu.vector_store %arg15[%c0_69, %c512], %62 {strides = array<i32>} : memref<1x1024xf32, #tpu.memory_space<vmem>>, vector<1x128xf32>,
    %64 = vector.extract_strided_slice %53 {offsets = [5, 0], sizes = [1, 128], strides = [1, 1]} : vector<8x128xf32> to vector<1x128xf32>
    %c0_70 = arith.constant 0 : index
    %c640 = arith.constant 640 : index
    %65 = vector.load %arg15[%c0_70, %c640] : memref<1x1024xf32, #tpu.memory_space<vmem>>, vector<1x128xf32>
    tpu.vector_store %arg15[%c0_70, %c640], %64 {strides = array<i32>} : memref<1x1024xf32, #tpu.memory_space<vmem>>, vector<1x128xf32>,
    %66 = vector.extract_strided_slice %53 {offsets = [6, 0], sizes = [1, 128], strides = [1, 1]} : vector<8x128xf32> to vector<1x128xf32>
    %c0_71 = arith.constant 0 : index
    %c768 = arith.constant 768 : index
    %67 = vector.load %arg15[%c0_71, %c768] : memref<1x1024xf32, #tpu.memory_space<vmem>>, vector<1x128xf32>
    tpu.vector_store %arg15[%c0_71, %c768], %66 {strides = array<i32>} : memref<1x1024xf32, #tpu.memory_space<vmem>>, vector<1x128xf32>,
    %68 = vector.extract_strided_slice %53 {offsets = [7, 0], sizes = [1, 128], strides = [1, 1]} : vector<8x128xf32> to vector<1x128xf32>
    %c0_72 = arith.constant 0 : index
    %c896 = arith.constant 896 : index
    %69 = vector.load %arg15[%c0_72, %c896] : memref<1x1024xf32, #tpu.memory_space<vmem>>, vector<1x128xf32>
    tpu.vector_store %arg15[%c0_72, %c896], %68 {strides = array<i32>} : memref<1x1024xf32, #tpu.memory_space<vmem>>, vector<1x128xf32>,
    %c0_73 = arith.constant 0 : index
    %c0_74 = arith.constant 0 : index
    %70 = vector.load %arg15[%c0_73, %c0_74] : memref<1x1024xf32, #tpu.memory_space<vmem>>, vector<1x1024xf32>
    %c0_75 = arith.constant 0 : index
    %c0_76 = arith.constant 0 : index
    %71 = vector.load %arg6[%c0_75, %c0_76] : memref<1024x64xf32, #tpu.memory_space<vmem>>, vector<1024x64xf32>
    %cst_77 = arith.constant dense<0.000000e+00> : vector<1x64xf32>
    %72 = tpu.matmul %70, %71, %cst_77 {dimension_numbers = #tpu.dot_dimension_numbers<[1], [0], [0], [1], [0, 0, 1, 1], [], []>} : vector<1x1024xf32>, vector<1024x64xf32>, vector<1x64xf32> -> vector<1x64xf32>
    %c0_78 = arith.constant 0 : index
    %c0_79 = arith.constant 0 : index
    %73 = vector.load %arg7[%c0_78, %c0_79] : memref<1x64xf32, #tpu.memory_space<vmem>>, vector<1x64xf32>
    %74 = arith.addf %72, %73 : vector<1x64xf32>
    %cst_80 = arith.constant 0.000000e+00 : f32
    %75 = vector.broadcast %cst_80 : f32 to vector<1x64xf32>
    %76 = arith.maximumf %74, %75 : vector<1x64xf32>
    %c0_81 = arith.constant 0 : index
    %c0_82 = arith.constant 0 : index
    %77 = vector.load %arg8[%c0_81, %c0_82] : memref<64x10xf32, #tpu.memory_space<vmem>>, vector<64x10xf32>
    %cst_83 = arith.constant dense<0.000000e+00> : vector<1x10xf32>
    %78 = tpu.matmul %76, %77, %cst_83 {dimension_numbers = #tpu.dot_dimension_numbers<[1], [0], [0], [1], [0, 0, 1, 1], [], []>} : vector<1x64xf32>, vector<64x10xf32>, vector<1x10xf32> -> vector<1x10xf32>
    %c0_84 = arith.constant 0 : index
    %c0_85 = arith.constant 0 : index
    %79 = vector.load %arg9[%c0_84, %c0_85] : memref<1x10xf32, #tpu.memory_space<vmem>>, vector<1x10xf32>
    %80 = arith.addf %78, %79 : vector<1x10xf32>
    %cst_86 = arith.constant dense<0xFF800000> : vector<1xf32>
    %81 = vector.multi_reduction <maximumf>, %80, %cst_86 [1] : vector<1x10xf32> to vector<1xf32>
    %82 = vector.shape_cast %81 : vector<1xf32> to vector<1x1xf32>
    %83 = vector.broadcast %82 : vector<1x1xf32> to vector<1x10xf32>
    %84 = arith.subf %80, %83 : vector<1x10xf32>
    %85 = math.exp %84 : vector<1x10xf32>
    %cst_87 = arith.constant dense<0.000000e+00> : vector<1xf32>
    %86 = vector.multi_reduction <add>, %85, %cst_87 [1] : vector<1x10xf32> to vector<1xf32>
    %87 = vector.shape_cast %86 : vector<1xf32> to vector<1x1xf32>
    %88 = vector.broadcast %87 : vector<1x1xf32> to vector<1x10xf32>
    %89 = arith.divf %85, %88 : vector<1x10xf32>
    %90 = vector.shape_cast %89 : vector<1x10xf32> to vector<1x1x10xf32>
    %c0_88 = arith.constant 0 : index
    %c0_89 = arith.constant 0 : index
    %c0_90 = arith.constant 0 : index
    %91 = vector.load %arg10[%c0_88, %c0_89, %c0_90] : memref<1x1x10xf32, #tpu.memory_space<vmem>>, vector<1x1x10xf32>
    tpu.vector_store %arg10[%c0_88, %c0_89, %c0_90], %90 {strides = array<i32>} : memref<1x1x10xf32, #tpu.memory_space<vmem>>, vector<1x1x10xf32>,
    return
  }
  func.func @transform_0(%arg0: i32) -> (i32, i32, i32, i32) {
    %c0_i32 = arith.constant 0 : i32
    %c0_i32_0 = arith.constant 0 : i32
    %c0_i32_1 = arith.constant 0 : i32
    %c0_i32_2 = arith.constant 0 : i32
    return %arg0, %c0_i32, %c0_i32_0, %c0_i32_1 : i32, i32, i32, i32
  }
  func.func @transform_1(%arg0: i32) -> (i32, i32) {
    %c0_i32 = arith.constant 0 : i32
    %c0_i32_0 = arith.constant 0 : i32
    %c0_i32_1 = arith.constant 0 : i32
    return %c0_i32, %c0_i32_0 : i32, i32
  }
  func.func @transform_2(%arg0: i32) -> (i32, i32) {
    %c0_i32 = arith.constant 0 : i32
    %c0_i32_0 = arith.constant 0 : i32
    %c0_i32_1 = arith.constant 0 : i32
    return %c0_i32, %c0_i32_0 : i32, i32
  }
  func.func @transform_3(%arg0: i32) -> (i32, i32) {
    %c0_i32 = arith.constant 0 : i32
    %c0_i32_0 = arith.constant 0 : i32
    %c0_i32_1 = arith.constant 0 : i32
    return %c0_i32, %c0_i32_0 : i32, i32
  }
  func.func @transform_4(%arg0: i32) -> (i32, i32) {
    %c0_i32 = arith.constant 0 : i32
    %c0_i32_0 = arith.constant 0 : i32
    %c0_i32_1 = arith.constant 0 : i32
    return %c0_i32, %c0_i32_0 : i32, i32
  }
  func.func @transform_5(%arg0: i32) -> (i32, i32) {
    %c0_i32 = arith.constant 0 : i32
    %c0_i32_0 = arith.constant 0 : i32
    %c0_i32_1 = arith.constant 0 : i32
    return %c0_i32, %c0_i32_0 : i32, i32
  }
  func.func @transform_6(%arg0: i32) -> (i32, i32) {
    %c0_i32 = arith.constant 0 : i32
    %c0_i32_0 = arith.constant 0 : i32
    %c0_i32_1 = arith.constant 0 : i32
    return %c0_i32, %c0_i32_0 : i32, i32
  }
  func.func @transform_7(%arg0: i32) -> (i32, i32) {
    %c0_i32 = arith.constant 0 : i32
    %c0_i32_0 = arith.constant 0 : i32
    %c0_i32_1 = arith.constant 0 : i32
    return %c0_i32, %c0_i32_0 : i32, i32
  }
  func.func @transform_8(%arg0: i32) -> (i32, i32) {
    %c0_i32 = arith.constant 0 : i32
    %c0_i32_0 = arith.constant 0 : i32
    %c0_i32_1 = arith.constant 0 : i32
    return %c0_i32, %c0_i32_0 : i32, i32
  }
  func.func @transform_9(%arg0: i32) -> (i32, i32, i32) {
    %c0_i32 = arith.constant 0 : i32
    %c0_i32_0 = arith.constant 0 : i32
    %c0_i32_1 = arith.constant 0 : i32
    return %arg0, %c0_i32, %c0_i32_0 : i32, i32, i32
  }
}

</mosaic_0001>

<bundles_post_ra>
// kernel: tpu_custom_call.1
= control target key start
LH: loop header
LB: loop body
LE: loop exit
PB: predicated region body
PF: predicated region fallthrough
CT: control target
= control target key end

     0   :  { %14 = vsyncpa [#allocation8], 0  ;;  %s4147_s0 = inlined_call_operand.hbm [shape: f32[2,3,32,32], index: 0, kind: input, shape index: {}]   ;;  %s4148_s1 = inlined_call_operand.vmem [shape: f32[384,256], index: 1, kind: input, shape index: {}]   ;;  %s4149_s2 = inlined_call_operand.vmem [shape: f32[1,128], index: 2, kind: input, shape index: {}]   ;;  %s4150_s3 = inlined_call_operand.vmem [shape: f32[384,256], index: 3, kind: input, shape index: {}]   ;;  %s4151_s4 = inlined_call_operand.vmem [shape: f32[1,128], index: 4, kind: input, shape index: {}]   ;;  %s4152_s5 = inlined_call_operand.vmem [shape: f32[1024,64], index: 5, kind: input, shape index: {}]   ;;  %s4153_s6 = inlined_call_operand.vmem [shape: f32[1,64], index: 6, kind: input, shape index: {}]   ;;  %s4154_s7 = inlined_call_operand.vmem [shape: f32[64,10], index: 7, kind: input, shape index: {}]   ;;  %s4155_s8 = inlined_call_operand.vmem [shape: f32[1,10], index: 8, kind: input, shape index: {}]   ;;  %s4156_s9 = inlined_call_operand.hbm [shape: f32[2,1,10], index: 9, kind: output, shape index: {}]  }
   0x1   :  { %16 = vsyncpa [#allocation8 + $0x1], 0 }
   0x2   :  { %17 = vsyncpa [#allocation9], 0 }
   0x3   :  { %19 = vsyncpa [#allocation9 + $0x1], 0  ;;  %s2809_s30 = smov 0   ;;  %s2811_s10 = smov 0  }
   0x4   :  { %s2813_s11 = smov 0   ;;  %s2815_s12 = smov 0  }
   0x5 LB: > { %4159 = sst [smem:[#allocation13_spill]] %s2743_s11  ;;  %s2830_s13 = sadd.s32 4294967295, %s2747_s12   ;;  %s2747_s12 = sphi %s2815_s12, %s4174_s12   ;;  %s2743_s11 = sphi %s2813_s11, %s4171_s11   ;;  %s2739_s10 = sphi %s2811_s10, %s4173_s10   ;;  %s2735_s30 = sphi %s2809_s30, %s4172_s30  }
   0x6   : > { %s2059_s14 = sadd.s32 4294967294, %s2747_s12   ;;  %s2834_s15 = sadd.s32 1, %s2747_s12  }
   0x7   : > { %s32_s16 = sadd.s32 1, %s2743_s11  ;;  %s29_s17 = ssub.s32 %s2747_s12, %s2834_s15 }
   0x8   : > { %p39_p0 = scmp.ne.s32.totalorder %s2743_s11, %s2739_s10  ;;  %p30_p1 = scmp.eq.s32.totalorder %s29_s17, 0 }
   0x9   : > { %p40_p2 = scmp.eq.s32.totalorder %s2747_s12, 0  ;;  %p45_p3 = scmp.ne.s32.totalorder %s2739_s10, %s2735_s30 }
   0xa   : > { %p46_p4 = scmp.eq.s32.totalorder %s2830_s13, 0  ;;  %p237_p7 = scmp.eq.s32.totalorder %s2830_s13, 1 }
   0xb   : > { %s2846_s18 = scalar_select %p30_p1, %s2743_s11, %s32_s16  }
   0xc   : > { %p41_p5 = por %p40_p2, %p39_p0  ;;  %p2848_p6 = por %p46_p4, %p45_p3 }
   0xd   : > { %4160 = sst [smem:[#allocation14_spill]] %s2846_s18  ;;  %p243_p8 = scmp.eq.s32.totalorder %s2059_s14, 1 }
   0xe   : > { %p2605_p10 = scmp.lt.s32.totalorder %s2747_s12, 2  ;;  %p2855_p11 = por %p237_p7, %p39_p0 }
   0xf   : > { %p2859_p12 = por %p243_p8, %p45_p3  ;;  %s287_s22 = sand.u32 1, %s2743_s11  }
  0x10   : > { %s4162_s20 = scalar_select %p2855_p11, 1, 0 }
  0x11   : > { %s4163_s21 = scalar_select %p2859_p12, 1, 0 }
  0x12   : > { %s2591_s23 = smul.u32 1536, %s2747_s12  ;;  %p2870_p13 = pnand %p2605_p10, %p41_p5 }
  0x13   : > { %s2590_s24 = smul.u32 96, %s287_s22  ;;  %s2876_s16 = scalar_lea.sflag [#allocation8], %s287_s22 }
  0x14   : > { %s2868_s27 = scalar_lea.hbm %s4147_s0, %s2591_s23  ;;  %p2653_p1 = pneg %p2870_p13 }
  0x15   : > { %s291_s29 = scalar_lea.vmem [#allocation7], %s2590_s24  ;;  %s2651_s17 = scalar_lea.hbm %s2868_s27, 1536 }
  0x16   : > { %s298_s14 = sshll.u32 %s291_s29, 4  ;;  %p2652_p0 = scmp.ne.s32.totalorder %s2868_s27, %s2651_s17  ;;  %s2874_s14 = int_to_ptr.vmem [resolvable:$true] %s298_s14 }
  0x17   : > { %s2656_s26 = scalar_lea.hbm %s4147_s0, 3072  ;;  %p2657_p4 = scmp.lt.u32.totalorder %s2868_s27, %s4147_s0 }
  0x18   : > { %p2654_p2 = pnand %p2653_p1, %p2652_p0  ;;  %p2658_p5 = scmp.lt.u32.totalorder %s2656_s26, %s2651_s17 }
  0x19   : > { %p2660_p8 = scmp.lt.u32.totalorder %s2651_s17, %s2868_s27 }
  0x1a   : > { %p2655_p3 = pneg %p2654_p2  ;;  %p2659_p7 = por %p2658_p5, %p2657_p4 }
  0x1c   : > { %p2661_p10 = por %p2660_p8, %p2659_p7 }
  0x1e   : > { %p2662_p9 = pnand %p2661_p10, %p2655_p3 }
  0x20   : > { %2665 = shalt.err (!%p2662_p9)
}
  0x21   : > { %s2666_s22 = scalar_lea.vmem %s2874_s14, 1536  ;;  %s2749_s24 = smov [#allocation7]  }
  0x22   : > { %p2667_p0 = scmp.ne.s32.totalorder %s2874_s14, %s2666_s22  ;;  %s2671_s29 = sshll.u32 %s2749_s24, 4  ;;  %s2672_s29 = int_to_ptr.vmem [resolvable:$false] %s2671_s29 }
  0x23   : > { %s2673_s11 = scalar_lea.vmem %s2672_s29, 3072  ;;  %p2674_p11 = scmp.lt.s32.totalorder %s2874_s14, %s2672_s29 }
  0x24   : > { %p2669_p2 = pnand %p2667_p0, %p2653_p1  ;;  %p2675_p4 = scmp.lt.s32.totalorder %s2673_s11, %s2666_s22 }
  0x26   : > { %p2670_p12 = pneg %p2669_p2  ;;  %p2676_p5 = por %p2675_p4, %p2674_p11 }
  0x28   : > { %p2677_p7 = pnand %p2676_p5, %p2670_p12 }
  0x2a   : > { %2680 = shalt.err (!%p2677_p7)
}
  0x2b   : > { %s2750_s18 = smov 128   ;;  %s2751_s17 = smov 8  }
  0x2c   : > { %2600 = dma.hbm_to_vmem [thread:$0]  (!%p2870_p13), %s2868_s27, 1536, %s2874_s14, %s2876_s16, %s2750_s18, %s2750_s18, %s2751_s17  }
  0x2d   : > { %p2063_p9 = scmp.ge.s32.totalorder %s2747_s12, 1  ;;  %p306_p1 = scmp.lt.s32.totalorder %s2747_s12, 3 }
  0x2f   : > { %p307_p3 = pnand %p2063_p9, %p306_p1 }
  0x30   : > { %s2907_s23 = sand.u32 (!%p307_p3), 1, %s2739_s10  }
  0x31   : > { %310 = sbr.rel (%p307_p3) target bundleno = 1555 (0x613), region = 56  ;;  %s313_s26 = scalar_lea.sflag (!%p307_p3), [#allocation8], %s2907_s23 }
  0x32   : > { %s2592_s25 = smul.u32 (!%p307_p3), 96, %s2907_s23 }
  0x34   : > { %s2911_s22 = scalar_lea.vmem (!%p307_p3), [#allocation7], %s2592_s25 }
  0x38   : > { %2726 = dma.done.wait (%p2848_p6), %s313_s26, 1536  }
  0x39   : > { %2728 = vsyncadd (%p2848_p6), %s313_s26, 4294965760  ;;  %v2752_v0 = vmov 0.0   ;;  %v2065_v1 = vld [vmem:[%s2911_s22 + $0x28] sm:$0xff]  ;;  %v2064_v2 = vld [vmem:[%s2911_s22 + $0x20] sm:$0xff]  ;;  %s2753_s19 = smov 32   ;;  %s2754_s28 = smov 64  }
  0x3a   : > { %351 = vst [vmem:[#allocation2 + $0x8] sm:$0xff] %v2752_v0  ;;  %352 = vst [vmem:[#allocation2 + $0x10] sm:$0xff] %v2752_v0  ;;  %375 = vrot.lane.b32.xlu1 %v2065_v1, %s2753_s19  ;;  %373 = vrot.lane.b32.xlu0 %v2064_v2, %s2753_s19  ;;  %v2069_v3 = vld [vmem:[%s2911_s22 + $0x48] sm:$0xff]  ;;  %v2068_v4 = vld [vmem:[%s2911_s22 + $0x40] sm:$0xff]  ;;  %vm359_vm0 = vcmask 261120   ;;  %vm385_vm1 = vcmask 523520  }
  0x3b   : > { %350 = vst [vmem:[#allocation2] sm:$0xff] %v2752_v0  ;;  %353 = vst [vmem:[#allocation2 + $0x18] sm:$0xff] %v2752_v0  ;;  %v453_v5 = vld [vmem:[%s4148_s1 + $0x8] sm:$0xff]  ;;  %v455_v6 = vld [vmem:[%s4148_s1 + $0x18] sm:$0xff]  ;;  %vm411_vm2 = vcmask 785920   ;;  %vm818_vm3 = vcmask 1041408  }
  0x3c   : > { %354 = vst [vmem:[#allocation2 + $0x20] sm:$0x3] %v2752_v0  ;;  %970 = vst [vmem:[#allocation4] sm:$0x1] %v2752_v0  ;;  %v452_v7 = vld [vmem:[%s4148_s1] sm:$0xff]  ;;  %v2066_v8 = vld [vmem:[%s2911_s22 + $0x30] sm:$0xff]  ;;  %v2246_v9 = vpack.c.bf16 %v455_v6, %v453_v5 }
  0x3d   : > { %971 = vst [vmem:[#allocation4 + $0x11] sm:$0x1] %v2752_v0  ;;  %v454_v10 = vld [vmem:[%s4148_s1 + $0x10] sm:$0xff]  ;;  %v457_v11 = vld [vmem:[%s4148_s1 + $0x28] sm:$0xff]  ;;  %v459_v12 = vld [vmem:[%s4148_s1 + $0x38] sm:$0xff]  ;;  %vm989_vm4 = vcmask 1041409  }
  0x3e   : > { %401 = vrot.lane.b32.xlu1 %v2069_v3, %s2754_s28  ;;  %399 = vrot.lane.b32.xlu0 %v2068_v4, %s2754_s28  ;;  %v2248_v13 = vpack.c.bf16 %v454_v10, %v452_v7  ;;  %v2250_v14 = vpack.c.bf16 %v459_v12, %v457_v11  ;;  %v456_v15 = vld [vmem:[%s4148_s1 + $0x20] sm:$0xff]  ;;  %v458_v16 = vld [vmem:[%s4148_s1 + $0x30] sm:$0xff]  ;;  %vm992_vm5 = vcmask 1042434   ;;  %vm995_vm6 = vcmask 1043459   ;;  %s2075_s26 = sshll.u32 %s2830_s13, 4  ;;  %s349_s27 = scalar_lea.vmem [#allocation10], %s2907_s23 }
  0x3f   : > { %v2070_v17 = vld [vmem:[%s2911_s22 + $0x50] sm:$0xff]  ;;  %2247 = vmatprep.subr.bf16.mxu0 %v2246_v9  ;;  %v461_v18 = vld [vmem:[%s4148_s1 + $0x48] sm:$0xff]  ;;  %v2252_v20 = vpack.c.bf16 %v458_v16, %v456_v15  ;;  %v460_v22 = vld [vmem:[%s4148_s1 + $0x40] sm:$0xff]  ;;  %vm998_vm7 = vcmask 1044484   ;;  %vm1001_vm8 = vcmask 1045509   ;;  %vm1004_vm9 = vcmask 1046534   ;;  %s4102_s29 = scalar_lea.hbm %s4156_s9, %s2075_s26 }
  0x40   : > { %v463_v19 = vld [vmem:[%s4148_s1 + $0x58] sm:$0xff]  ;;  %2249 = vmatpush1.bf16.msra.mxu0 %v2248_v13  ;;  %v462_v23 = vld [vmem:[%s4148_s1 + $0x50] sm:$0xff]  ;;  %v465_v24 = vld [vmem:[%s4148_s1 + $0x68] sm:$0xff]  ;;  %vm1007_vm10 = vcmask 1047559   ;;  %vm2757_vm12 = vmmov 0   ;;  %vm1893_vm13 = vcmask 523264  }
  0x41   : > { %2251 = vmatprep.subr.bf16.mxu0 %v2250_v14  ;;  %v2254_v21 = vpack.c.bf16 %v463_v19, %v461_v18  ;;  %v467_v25 = vld [vmem:[%s4148_s1 + $0x78] sm:$0xff]  ;;  %v2067_v26 = vld [vmem:[%s2911_s22 + $0x38] sm:$0xff]  ;;  %v2256_v28 = vpack.c.bf16 %v462_v23, %v460_v22  ;;  %v466_v31 = vld [vmem:[%s4148_s1 + $0x70] sm:$0xff]  ;;  %vm1967_vm14 = vcmask 73728   ;;  %s1993_s14 = sshll.u32 %s349_s27, 4  ;;  %s1981_s11 = scalar_lea.sflag [#allocation9], %s2907_s23  ;;  %s4104_s14 = int_to_ptr.vmem [resolvable:$true] %s1993_s14 }
  0x42   : > { %377 = vrot.lane.b32.xlu0 %v2066_v8, %s2753_s19  ;;  %403 = vrot.lane.b32.xlu1 %v2070_v17, %s2754_s28  ;;  %v2071_v27 = vld [vmem:[%s2911_s22 + $0x58] sm:$0xff]  ;;  %v2258_v29 = vpack.c.bf16 %v467_v25, %v465_v24  ;;  %v469_v32 = vld [vmem:[%s4148_s1 + $0x88] sm:$0xff]  ;;  %s2681_s18 = scalar_lea.vmem %s4104_s14, 16  ;;  %p4167_p11 = scmp.ne.s32.totalorder %s4162_s20, 0 }
  0x43   : > { %v464_v30 = vld [vmem:[%s4148_s1 + $0x60] sm:$0xff]  ;;  %v471_v33 = vld [vmem:[%s4148_s1 + $0x98] sm:$0xff]  ;;  %v470_v37 = vld [vmem:[%s4148_s1 + $0x90] sm:$0xff]  ;;  %p2682_p6 = scmp.ne.s32.totalorder %s4104_s14, %s2681_s18  ;;  %s2758_s13 = smov [#allocation10]  }
  0x44   : > { %2253 = vmatpush1.bf16.msra.mxu0 %v2252_v20  ;;  %v2260_v34 = vpack.c.bf16 %v466_v31, %v464_v30  ;;  %v2262_v35 = vpack.c.bf16 %v471_v33, %v469_v32  ;;  %v468_v36 = vld [vmem:[%s4148_s1 + $0x80] sm:$0xff]  ;;  %v473_v38 = vld [vmem:[%s4148_s1 + $0xa8] sm:$0xff]  ;;  %v475_v39 = vld [vmem:[%s4148_s1 + $0xb8] sm:$0xff] }
  0x45   : > { %2255 = vmatprep.subr.bf16.mxu0 %v2254_v21  ;;  %v2264_v40 = vpack.c.bf16 %v470_v37, %v468_v36  ;;  %v2266_v41 = vpack.c.bf16 %v475_v39, %v473_v38  ;;  %v472_v42 = vld [vmem:[%s4148_s1 + $0xa0] sm:$0xff]  ;;  %v474_v43 = vld [vmem:[%s4148_s1 + $0xb0] sm:$0xff]  ;;  %v477_v44 = vld [vmem:[%s4148_s1 + $0xc8] sm:$0xff]  ;;  %p2683_p12 = pnand %p2682_p6, %p4167_p11 }
  0x46   : > { %379 = vrot.lane.b32.xlu0 %v2067_v26, %s2753_s19  ;;  %405 = vrot.lane.b32.xlu1 %v2071_v27, %s2754_s28  ;;  %v479_v45 = vld [vmem:[%s4148_s1 + $0xd8] sm:$0xff]  ;;  %v356_v46 = vld [vmem:[%s2911_s22 + $0x8] sm:$0xff]  ;;  %v2268_v48 = vpack.c.bf16 %v474_v43, %v472_v42  ;;  %s2685_s19 = sshll.u32 %s2758_s13, 4  ;;  %s2686_s19 = int_to_ptr.vmem [resolvable:$false] %s2685_s19 }
  0x47   : > { %v355_v47 = vld [vmem:[%s2911_s22] sm:$0xff]  ;;  %361 = vst.msk [vmem:[#allocation2 + $0x9] sm:$0xff] %vm359_vm0, %v356_v46  ;;  %v2270_v49 = vpack.c.bf16 %v479_v45, %v477_v44  ;;  %v476_v50 = vld [vmem:[%s4148_s1 + $0xc0] sm:$0xff]  ;;  %v478_v51 = vld [vmem:[%s4148_s1 + $0xd0] sm:$0xff]  ;;  %p2684_p13 = pneg %p2683_p12  ;;  %p2688_p8 = scmp.lt.s32.totalorder %s4104_s14, %s2686_s19 }
  0x48   : > { %2257 = vmatpush1.bf16.msra.mxu0 %v2256_v28  ;;  %360 = vst.msk [vmem:[#allocation2 + $0x1] sm:$0xff] %vm359_vm0, %v355_v47  ;;  %v481_v52 = vld [vmem:[%s4148_s1 + $0xe8] sm:$0xff]  ;;  %v483_v53 = vld [vmem:[%s4148_s1 + $0xf8] sm:$0xff]  ;;  %v2272_v54 = vpack.c.bf16 %v478_v51, %v476_v50  ;;  %v480_v56 = vld [vmem:[%s4148_s1 + $0xe0] sm:$0xff] }
  0x49   : > { %2259 = vmatprep.subr.bf16.mxu0 %v2258_v29  ;;  %v2274_v55 = vpack.c.bf16 %v483_v53, %v481_v52  ;;  %v482_v57 = vld [vmem:[%s4148_s1 + $0xf0] sm:$0xff]  ;;  %v357_v58 = vld [vmem:[%s2911_s22 + $0x10] sm:$0xff]  ;;  %v485_v59 = vld [vmem:[%s4148_s1 + $0x108] sm:$0xff] }
  0x4a   : > { %v487_v60 = vld [vmem:[%s4148_s1 + $0x118] sm:$0xff]  ;;  %362 = vst.msk [vmem:[#allocation2 + $0x11] sm:$0xff] %vm359_vm0, %v357_v58  ;;  %v358_v61 = vld [vmem:[%s2911_s22 + $0x18] sm:$0xff]  ;;  %v2276_v62 = vpack.c.bf16 %v482_v57, %v480_v56  ;;  %v486_v2 = vld [vmem:[%s4148_s1 + $0x110] sm:$0xff]  ;;  %s2687_s22 = scalar_lea.vmem %s2686_s19, 32 }
  0x4b   : > { %363 = vst.msk [vmem:[#allocation2 + $0x19] sm:$0xff] %vm359_vm0, %v358_v61  ;;  %v2278_v63 = vpack.c.bf16 %v487_v60, %v485_v59  ;;  %v484_v1 = vld [vmem:[%s4148_s1 + $0x100] sm:$0xff]  ;;  %v489_v3 = vld [vmem:[%s4148_s1 + $0x128] sm:$0xff]  ;;  %v491_v4 = vld [vmem:[%s4148_s1 + $0x138] sm:$0xff]  ;;  %p2689_p10 = scmp.lt.s32.totalorder %s2687_s22, %s2681_s18 }
  0x4c   : > { %2261 = vmatpush1.bf16.msra.mxu0 %v2260_v34  ;;  %v2280_v5 = vpack.c.bf16 %v486_v2, %v484_v1  ;;  %v2282_v6 = vpack.c.bf16 %v491_v4, %v489_v3  ;;  %v488_v7 = vld [vmem:[%s4148_s1 + $0x120] sm:$0xff]  ;;  %v490_v8 = vld [vmem:[%s4148_s1 + $0x130] sm:$0xff]  ;;  %v493_v9 = vld [vmem:[%s4148_s1 + $0x148] sm:$0xff] }
  0x4d   : > { %2263 = vmatprep.subr.bf16.mxu0 %v2262_v35  ;;  %v495_v10 = vld [vmem:[%s4148_s1 + $0x158] sm:$0xff]  ;;  %v2284_v11 = vpack.c.bf16 %v490_v8, %v488_v7  ;;  %v492_v13 = vld [vmem:[%s4148_s1 + $0x140] sm:$0xff]  ;;  %v494_v14 = vld [vmem:[%s4148_s1 + $0x150] sm:$0xff]  ;;  %p2690_p0 = por %p2689_p10, %p2688_p8 }
  0x4e   : > { %v2286_v12 = vpack.c.bf16 %v495_v10, %v493_v9  ;;  %v497_v15 = vld [vmem:[%s4148_s1 + $0x168] sm:$0xff]  ;;  %v499_v16 = vld [vmem:[%s4148_s1 + $0x178] sm:$0xff]  ;;  %v2288_v17 = vpack.c.bf16 %v494_v14, %v492_v13  ;;  %v496_v18 = vld [vmem:[%s4148_s1 + $0x160] sm:$0xff] }
  0x4f   : > { %v2290_v19 = vpack.c.bf16 %v499_v16, %v497_v15  ;;  %v498_v20 = vld [vmem:[%s4148_s1 + $0x170] sm:$0xff]  ;;  %v501_v21 = vld [vmem:[%s4148_s1 + $0x188] sm:$0xff]  ;;  %v503_v22 = vld [vmem:[%s4148_s1 + $0x198] sm:$0xff]  ;;  %p2691_p2 = pnand %p2690_p0, %p2684_p13 }
  0x50   : > { %2265 = vmatpush1.bf16.msra.mxu0 %v2264_v40  ;;  %v1046_v23 = vld [vmem:[%s4150_s3 + $0x8] sm:$0xff]  ;;  %v1048_v24 = vld [vmem:[%s4150_s3 + $0x18] sm:$0xff]  ;;  %v1045_v25 = vld [vmem:[%s4150_s3] sm:$0xff]  ;;  %v2292_v30 = vpack.c.bf16 %v498_v20, %v496_v18  ;;  %v2294_v36 = vpack.c.bf16 %v503_v22, %v501_v21 }
  0x51   : > { %2267 = vmatprep.subr.bf16.mxu0 %v2266_v41  ;;  %v2342_v26 = vpack.c.bf16 %v1048_v24, %v1046_v23  ;;  %v1047_v27 = vld [vmem:[%s4150_s3 + $0x10] sm:$0xff]  ;;  %v1050_v28 = vld [vmem:[%s4150_s3 + $0x28] sm:$0xff]  ;;  %v1052_v29 = vld [vmem:[%s4150_s3 + $0x38] sm:$0xff] }
  0x52   : > { %v2344_v31 = vpack.c.bf16 %v1047_v27, %v1045_v25  ;;  %v2346_v32 = vpack.c.bf16 %v1052_v29, %v1050_v28  ;;  %v1049_v33 = vld [vmem:[%s4150_s3 + $0x20] sm:$0xff]  ;;  %v1051_v34 = vld [vmem:[%s4150_s3 + $0x30] sm:$0xff]  ;;  %v1054_v35 = vld [vmem:[%s4150_s3 + $0x48] sm:$0xff] }
  0x53   : > { %v500_v37 = vld [vmem:[%s4148_s1 + $0x180] sm:$0xff]  ;;  %v502_v38 = vld [vmem:[%s4148_s1 + $0x190] sm:$0xff]  ;;  %2343 = vmatprep.subr.bf16.mxu1 %v2342_v26  ;;  %v1056_v39 = vld [vmem:[%s4150_s3 + $0x58] sm:$0xff]  ;;  %v2348_v42 = vpack.c.bf16 %v1051_v34, %v1049_v33 }
  0x54   : > { %2269 = vmatpush1.bf16.msra.mxu0 %v2268_v48  ;;  %v505_v40 = vld [vmem:[%s4148_s1 + $0x1a8] sm:$0xff]  ;;  %v507_v41 = vld [vmem:[%s4148_s1 + $0x1b8] sm:$0xff]  ;;  %2345 = vmatpush1.bf16.msra.mxu1 %v2344_v31  ;;  %v2350_v43 = vpack.c.bf16 %v1056_v39, %v1054_v35  ;;  %v1053_v44 = vld [vmem:[%s4150_s3 + $0x40] sm:$0xff]  ;;  %v2296_v46 = vpack.c.bf16 %v502_v38, %v500_v37 }
  0x55   : > { %2271 = vmatprep.subr.bf16.mxu0 %v2270_v49  ;;  %2347 = vmatprep.subr.bf16.mxu1 %v2346_v32  ;;  %v1055_v45 = vld [vmem:[%s4150_s3 + $0x50] sm:$0xff]  ;;  %v1058_v47 = vld [vmem:[%s4150_s3 + $0x68] sm:$0xff]  ;;  %v1060_v48 = vld [vmem:[%s4150_s3 + $0x78] sm:$0xff]  ;;  %v2298_v49 = vpack.c.bf16 %v507_v41, %v505_v40 }
  0x56   : > { %v504_v50 = vld [vmem:[%s4148_s1 + $0x1a0] sm:$0xff]  ;;  %v506_v51 = vld [vmem:[%s4148_s1 + $0x1b0] sm:$0xff]  ;;  %v509_v52 = vld [vmem:[%s4148_s1 + $0x1c8] sm:$0xff] }
  0x57   : > { %v511_v53 = vld [vmem:[%s4148_s1 + $0x1d8] sm:$0xff]  ;;  %v1057_v56 = vld [vmem:[%s4150_s3 + $0x60] sm:$0xff]  ;;  %v1059_v57 = vld [vmem:[%s4150_s3 + $0x70] sm:$0xff]  ;;  %v2300_v58 = vpack.c.bf16 %v506_v51, %v504_v50 }
  0x58   : > { %2273 = vmatpush1.bf16.msra.mxu0 %v2272_v54  ;;  %2349 = vmatpush1.bf16.msra.mxu1 %v2348_v42  ;;  %v2352_v54 = vpack.c.bf16 %v1055_v45, %v1053_v44  ;;  %v1062_v59 = vld [vmem:[%s4150_s3 + $0x88] sm:$0xff]  ;;  %v1064_v60 = vld [vmem:[%s4150_s3 + $0x98] sm:$0xff]  ;;  %v2302_v61 = vpack.c.bf16 %v511_v53, %v509_v52  ;;  %v2356_v3 = vpack.c.bf16 %v1059_v57, %v1057_v56  ;;  %v1067_v18 = vld [vmem:[%s4150_s3 + $0xb0] sm:$0xff] }
  0x59   : > { %2275 = vmatprep.subr.bf16.mxu0 %v2274_v55  ;;  %2351 = vmatprep.subr.bf16.mxu1 %v2350_v43  ;;  %v2354_v55 = vpack.c.bf16 %v1060_v48, %v1058_v47  ;;  %v513_v1 = vld [vmem:[%s4148_s1 + $0x1e8] sm:$0xff]  ;;  %v515_v2 = vld [vmem:[%s4148_s1 + $0x1f8] sm:$0xff]  ;;  %v2358_v4 = vpack.c.bf16 %v1064_v60, %v1062_v59  ;;  %v516_v26 = vld [vmem:[%s4148_s1 + $0x200] sm:$0xff] }
  0x5a   : > { %v1066_v8 = vld [vmem:[%s4150_s3 + $0xa8] sm:$0xff]  ;;  %v1068_v9 = vld [vmem:[%s4150_s3 + $0xb8] sm:$0xff]  ;;  %v2306_v10 = vpack.c.bf16 %v515_v2, %v513_v1  ;;  %v518_v27 = vld [vmem:[%s4148_s1 + $0x210] sm:$0xff] }
  0x5b   : > { %v517_v13 = vld [vmem:[%s4148_s1 + $0x208] sm:$0xff]  ;;  %v519_v14 = vld [vmem:[%s4148_s1 + $0x218] sm:$0xff]  ;;  %v2362_v16 = vpack.c.bf16 %v1068_v9, %v1066_v8  ;;  %v2312_v32 = vpack.c.bf16 %v518_v27, %v516_v26  ;;  %v520_v33 = vld [vmem:[%s4148_s1 + $0x220] sm:$0xff] }
  0x5c   : > { %2277 = vmatpush1.bf16.msra.mxu0 %v2276_v62  ;;  %v508_v62 = vld [vmem:[%s4148_s1 + $0x1c0] sm:$0xff]  ;;  %2353 = vmatpush1.bf16.msra.mxu1 %v2352_v54  ;;  %v2310_v20 = vpack.c.bf16 %v519_v14, %v517_v13  ;;  %v523_v31 = vld [vmem:[%s4148_s1 + $0x238] sm:$0xff]  ;;  %v522_v34 = vld [vmem:[%s4148_s1 + $0x230] sm:$0xff] }
  0x5d   : > { %2279 = vmatprep.subr.bf16.mxu0 %v2278_v63  ;;  %v510_v63 = vld [vmem:[%s4148_s1 + $0x1d0] sm:$0xff]  ;;  %2355 = vmatprep.subr.bf16.mxu1 %v2354_v55  ;;  %v525_v41 = vld [vmem:[%s4148_s1 + $0x248] sm:$0xff]  ;;  %v527_v42 = vld [vmem:[%s4148_s1 + $0x258] sm:$0xff]  ;;  %v2316_v43 = vpack.c.bf16 %v522_v34, %v520_v33 }
  0x5e   : > { %v2304_v7 = vpack.c.bf16 %v510_v63, %v508_v62  ;;  %v2318_v44 = vpack.c.bf16 %v527_v42, %v525_v41  ;;  %v524_v45 = vld [vmem:[%s4148_s1 + $0x240] sm:$0xff]  ;;  %v529_v47 = vld [vmem:[%s4148_s1 + $0x268] sm:$0xff]  ;;  %v530_v55 = vld [vmem:[%s4148_s1 + $0x270] sm:$0xff] }
  0x5f   : > { %v528_v54 = vld [vmem:[%s4148_s1 + $0x260] sm:$0xff]  ;;  %v533_v56 = vld [vmem:[%s4148_s1 + $0x288] sm:$0xff]  ;;  %v535_v57 = vld [vmem:[%s4148_s1 + $0x298] sm:$0xff] }
  0x60   : > { %2281 = vmatpush1.bf16.msra.mxu0 %v2280_v5  ;;  %v1061_v5 = vld [vmem:[%s4150_s3 + $0x80] sm:$0xff]  ;;  %2357 = vmatpush1.bf16.msra.mxu1 %v2356_v3  ;;  %v2324_v59 = vpack.c.bf16 %v530_v55, %v528_v54  ;;  %v534_v63 = vld [vmem:[%s4148_s1 + $0x290] sm:$0xff]  ;;  %v537_v1 = vld [vmem:[%s4148_s1 + $0x2a8] sm:$0xff] }
  0x61   : > { %2283 = vmatprep.subr.bf16.mxu0 %v2282_v6  ;;  %v1063_v6 = vld [vmem:[%s4150_s3 + $0x90] sm:$0xff]  ;;  %2359 = vmatprep.subr.bf16.mxu1 %v2358_v4  ;;  %v532_v62 = vld [vmem:[%s4148_s1 + $0x280] sm:$0xff]  ;;  %v539_v2 = vld [vmem:[%s4148_s1 + $0x2b8] sm:$0xff] }
  0x62   : > { %v2360_v15 = vpack.c.bf16 %v1063_v6, %v1061_v5  ;;  %v2328_v3 = vpack.c.bf16 %v534_v63, %v532_v62  ;;  %v2330_v4 = vpack.c.bf16 %v539_v2, %v537_v1  ;;  %v536_v5 = vld [vmem:[%s4148_s1 + $0x2a0] sm:$0xff]  ;;  %v538_v6 = vld [vmem:[%s4148_s1 + $0x2b0] sm:$0xff]  ;;  %v543_v8 = vld [vmem:[%s4148_s1 + $0x2d8] sm:$0xff] }
  0x63   : > { %v2332_v9 = vpack.c.bf16 %v538_v6, %v536_v5  ;;  %v545_v13 = vld [vmem:[%s4148_s1 + $0x2e8] sm:$0xff]  ;;  %v547_v14 = vld [vmem:[%s4148_s1 + $0x2f8] sm:$0xff]  ;;  %v1069_v27 = vld [vmem:[%s4150_s3 + $0xc0] sm:$0xff] }
  0x64   : > { %2285 = vmatpush1.bf16.msra.mxu0 %v2284_v11  ;;  %v512_v11 = vld [vmem:[%s4148_s1 + $0x1e0] sm:$0xff]  ;;  %2361 = vmatpush1.bf16.msra.mxu1 %v2360_v15  ;;  %v1075_v34 = vld [vmem:[%s4150_s3 + $0xf0] sm:$0xff]  ;;  %v1082_v42 = vld [vmem:[%s4150_s3 + $0x128] sm:$0xff] }
  0x65   : > { %2287 = vmatprep.subr.bf16.mxu0 %v2286_v12  ;;  %v514_v12 = vld [vmem:[%s4148_s1 + $0x1f0] sm:$0xff]  ;;  %2363 = vmatprep.subr.bf16.mxu1 %v2362_v16  ;;  %v2338_v16 = vpack.c.bf16 %v547_v14, %v545_v13  ;;  %v1073_v33 = vld [vmem:[%s4150_s3 + $0xe0] sm:$0xff]  ;;  %v1090_v54 = vld [vmem:[%s4150_s3 + $0x168] sm:$0xff] }
  0x66   : > { %v1092_v55 = vld [vmem:[%s4150_s3 + $0x178] sm:$0xff]  ;;  %v1093_v63 = vld [vmem:[%s4150_s3 + $0x180] sm:$0xff]  ;;  %v1095_v1 = vld [vmem:[%s4150_s3 + $0x190] sm:$0xff] }
  0x67   : > { %v2392_v2 = vpack.c.bf16 %v1095_v1, %v1093_v63  ;;  %v1097_v6 = vld [vmem:[%s4150_s3 + $0x1a0] sm:$0xff]  ;;  %v1103_v13 = vld [vmem:[%s4150_s3 + $0x1d0] sm:$0xff] }
  0x68   : > { %2289 = vmatpush1.bf16.msra.mxu0 %v2288_v17  ;;  %v1065_v17 = vld [vmem:[%s4150_s3 + $0xa0] sm:$0xff] }
  0x69   : > { %2291 = vmatprep.subr.bf16.mxu0 %v2290_v19  ;;  %v2308_v19 = vpack.c.bf16 %v514_v12, %v512_v11  ;;  %v2364_v21 = vpack.c.bf16 %v1067_v18, %v1065_v17  ;;  %v540_v11 = vld [vmem:[%s4148_s1 + $0x2c0] sm:$0xff]  ;;  %v542_v12 = vld [vmem:[%s4148_s1 + $0x2d0] sm:$0xff] }
  0x6a   : > { %v2336_v15 = vpack.c.bf16 %v542_v12, %v540_v11  ;;  %v544_v17 = vld [vmem:[%s4148_s1 + $0x2e0] sm:$0xff]  ;;  %v546_v18 = vld [vmem:[%s4148_s1 + $0x2f0] sm:$0xff] }
  0x6b   : > { %2365 = vmatpush1.bf16.msra.mxu1 %v2364_v21  ;;  %v1101_v12 = vld [vmem:[%s4150_s3 + $0x1c0] sm:$0xff] }
  0x6c   : > { %2293 = vmatpush1.bf16.msra.mxu0 %v2292_v30  ;;  %v521_v30 = vld [vmem:[%s4148_s1 + $0x228] sm:$0xff]  ;;  %v2400_v14 = vpack.c.bf16 %v1103_v13, %v1101_v12 }
  0x6d   : > { %2295 = vmatprep.subr.bf16.mxu0 %v2294_v36  ;;  %v2314_v38 = vpack.c.bf16 %v523_v31, %v521_v30  ;;  %v1074_v30 = vld [vmem:[%s4150_s3 + $0xe8] sm:$0xff]  ;;  %v1076_v31 = vld [vmem:[%s4150_s3 + $0xf8] sm:$0xff] }
  0x70   : > { %2297 = vmatpush1.bf16.msra.mxu0 %v2296_v46  ;;  %v526_v46 = vld [vmem:[%s4148_s1 + $0x250] sm:$0xff] }
  0x71   : > { %2299 = vmatprep.subr.bf16.mxu0 %v2298_v49  ;;  %v531_v49 = vld [vmem:[%s4148_s1 + $0x278] sm:$0xff]  ;;  %v2320_v51 = vpack.c.bf16 %v526_v46, %v524_v45  ;;  %v1081_v45 = vld [vmem:[%s4150_s3 + $0x120] sm:$0xff]  ;;  %v1083_v46 = vld [vmem:[%s4150_s3 + $0x130] sm:$0xff] }
  0x72   : > { %v2322_v53 = vpack.c.bf16 %v531_v49, %v529_v47  ;;  %v2380_v47 = vpack.c.bf16 %v1083_v46, %v1081_v45  ;;  %v1088_v49 = vld [vmem:[%s4150_s3 + $0x158] sm:$0xff] }
  0x74   : > { %2301 = vmatpush1.bf16.msra.mxu0 %v2300_v58 }
  0x75   : > { %2303 = vmatprep.subr.bf16.mxu0 %v2302_v61  ;;  %v2326_v61 = vpack.c.bf16 %v535_v57, %v533_v56  ;;  %v2386_v56 = vpack.c.bf16 %v1092_v55, %v1090_v54  ;;  %v1089_v57 = vld [vmem:[%s4150_s3 + $0x160] sm:$0xff] }
  0x78   : > { %2305 = vmatpush1.bf16.msra.mxu0 %v2304_v7  ;;  %v541_v7 = vld [vmem:[%s4148_s1 + $0x2c8] sm:$0xff] }
  0x79   : > { %2307 = vmatprep.subr.bf16.mxu0 %v2306_v10  ;;  %v2334_v10 = vpack.c.bf16 %v543_v8, %v541_v7  ;;  %v1099_v7 = vld [vmem:[%s4150_s3 + $0x1b0] sm:$0xff] }
  0x7a   : > { %v2396_v8 = vpack.c.bf16 %v1099_v7, %v1097_v6 }
  0x7c   : > { %2309 = vmatpush1.bf16.msra.mxu0 %v2308_v19  ;;  %v2340_v19 = vpack.c.bf16 %v546_v18, %v544_v17  ;;  %v1105_v18 = vld [vmem:[%s4150_s3 + $0x1e0] sm:$0xff] }
  0x7d   : > { %2311 = vmatprep.subr.bf16.mxu0 %v2310_v20 }
  0xac   : > { %v376_v22 = vpop.permute.xlu1 %375  ;;  %v374_v23 = vpop.permute.xlu0 %373 }
  0xad   : > { %387 = vst.msk [vmem:[#allocation2 + $0x9] sm:$0xff] %vm385_vm1, %v376_v22  ;;  %386 = vst.msk [vmem:[#allocation2 + $0x1] sm:$0xff] %vm385_vm1, %v374_v23 }
  0xb0   : > { %v402_v24 = vpop.permute.xlu1 %401  ;;  %v400_v25 = vpop.permute.xlu0 %399 }
  0xb1   : > { %413 = vst.msk [vmem:[#allocation2 + $0x9] sm:$0xff] %vm411_vm2, %v402_v24  ;;  %412 = vst.msk [vmem:[#allocation2 + $0x1] sm:$0xff] %vm411_vm2, %v400_v25  ;;  %v1070_v24 = vld [vmem:[%s4150_s3 + $0xc8] sm:$0xff]  ;;  %v1072_v25 = vld [vmem:[%s4150_s3 + $0xd8] sm:$0xff] }
  0xb2   : > { %v2366_v26 = vpack.c.bf16 %v1072_v25, %v1070_v24  ;;  %v2755_v24 = vmov 1983009808  }
  0xb3   : > { %v736_v25 = vunpack.c.l.s4 %v2755_v24 }
  0xb4   : > { %v378_v28 = vpop.permute.xlu0 %377  ;;  %v404_v29 = vpop.permute.xlu1 %403  ;;  %2367 = vmatprep.subr.bf16.mxu1 %v2366_v26  ;;  %v738_v26 = vlaneseq }
  0xb5   : > { %388 = vst.msk [vmem:[#allocation2 + $0x11] sm:$0xff] %vm385_vm1, %v378_v28  ;;  %v1071_v28 = vld [vmem:[%s4150_s3 + $0xd0] sm:$0xff] }
  0xb6   : > { %414 = vst.msk [vmem:[#allocation2 + $0x11] sm:$0xff] %vm411_vm2, %v404_v29  ;;  %v2368_v29 = vpack.c.bf16 %v1071_v28, %v1069_v27  ;;  %v737_v27 = vunpack.c.0.s8 %v736_v25  ;;  %v3447_v28 = vshrl.u32 %v738_v26, 7  ;;  %vm3839_vm11 = vcmp.lt.s32.totalorder %v738_v26, 128 }
  0xb8   : > { %v424_v35 = vld [vmem:[#allocation2 + $0x1] sm:$0xff]  ;;  %v425_v37 = vld [vmem:[#allocation2 + $0x9] sm:$0xff]  ;;  %v380_v39 = vpop.permute.xlu0 %379  ;;  %v406_v40 = vpop.permute.xlu1 %405  ;;  %2369 = vmatpush1.bf16.msra.mxu1 %v2368_v29 }
  0xb9   : > { %v416_v36 = vld [vmem:[#allocation2] sm:$0xff]  ;;  %612 = vmatprep.mubr.f32.mxu0 %v424_v35  ;;  %389 = vst.msk [vmem:[#allocation2 + $0x19] sm:$0xff] %vm385_vm1, %v380_v39  ;;  %v417_v48 = vld [vmem:[#allocation2 + $0x8] sm:$0xff]  ;;  %v2372_v35 = vpack.c.bf16 %v1075_v34, %v1073_v33 }
  0xba   : > { %613 = vmatmul.mubr.f32.vlgmr.msra.gmra.mrb[0].mxu0 %v416_v36  ;;  %415 = vst.msk [vmem:[#allocation2 + $0x19] sm:$0xff] %vm411_vm2, %v406_v40  ;;  %v432_v20 = vld [vmem:[#allocation2 + $0x2] sm:$0xff]  ;;  %v1079_v40 = vld [vmem:[%s4150_s3 + $0x110] sm:$0xff] }
  0xbb   : > { %2313 = vmatpush1.bf16.msra.mxu0 %v2312_v32  ;;  %618 = vmatprep.mubr.f32.mxu0 %v425_v37  ;;  %v2370_v32 = vpack.c.bf16 %v1076_v31, %v1074_v30  ;;  %v1078_v36 = vld [vmem:[%s4150_s3 + $0x108] sm:$0xff]  ;;  %v1080_v37 = vld [vmem:[%s4150_s3 + $0x118] sm:$0xff]  ;;  %v1077_v39 = vld [vmem:[%s4150_s3 + $0x100] sm:$0xff]  ;;  %v3450_v30 = vsub.s32 %v737_v27, %v3447_v28 }
  0xbc   : > { %2315 = vmatprep.subr.bf16.mxu0 %v2314_v38  ;;  %v2374_v38 = vpack.c.bf16 %v1080_v37, %v1078_v36  ;;  %v2376_v41 = vpack.c.bf16 %v1079_v40, %v1077_v39 }
  0xbd   : > { %v426_v50 = vld [vmem:[#allocation2 + $0x11] sm:$0xff]  ;;  %2371 = vmatprep.subr.bf16.mxu1 %v2370_v32 }
  0xbe   : > { %619 = vmatmul.mubr.f32.gmra.mrb[2].mxu0 %v417_v48  ;;  %v418_v52 = vld [vmem:[#allocation2 + $0x10] sm:$0xff]  ;;  %2373 = vmatpush1.bf16.msra.mxu1 %v2372_v35  ;;  %v1086_v48 = vld [vmem:[%s4150_s3 + $0x148] sm:$0xff] }
  0xbf   : > { %2317 = vmatpush1.bf16.msra.mxu0 %v2316_v43  ;;  %624 = vmatprep.mubr.f32.mxu0 %v426_v50  ;;  %v433_v21 = vld [vmem:[#allocation2 + $0xa] sm:$0xff]  ;;  %v1084_v43 = vld [vmem:[%s4150_s3 + $0x138] sm:$0xff]  ;;  %v2382_v50 = vpack.c.bf16 %v1088_v49, %v1086_v48 }
  0xc0   : > { %2319 = vmatprep.subr.bf16.mxu0 %v2318_v44  ;;  %2375 = vmatprep.subr.bf16.mxu1 %v2374_v38  ;;  %v2378_v44 = vpack.c.bf16 %v1084_v43, %v1082_v42 }
  0xc1   : > { %v427_v58 = vld [vmem:[#allocation2 + $0x19] sm:$0xff] }
  0xc2   : > { %625 = vmatmul.mubr.f32.gmra.mrb[4].mxu0 %v418_v52  ;;  %v419_v60 = vld [vmem:[#allocation2 + $0x18] sm:$0xff]  ;;  %2377 = vmatpush1.bf16.msra.mxu1 %v2376_v41  ;;  %v1087_v52 = vld [vmem:[%s4150_s3 + $0x150] sm:$0xff] }
  0xc3   : > { %2321 = vmatpush1.bf16.msra.mxu0 %v2320_v51  ;;  %630 = vmatprep.mubr.f32.mxu0 %v427_v58  ;;  %v434_v22 = vld [vmem:[#allocation2 + $0x12] sm:$0xff]  ;;  %v435_v23 = vld [vmem:[#allocation2 + $0x1a] sm:$0xff] }
  0xc4   : > { %2323 = vmatprep.subr.bf16.mxu0 %v2322_v53  ;;  %2379 = vmatprep.subr.bf16.mxu1 %v2378_v44  ;;  %v1085_v51 = vld [vmem:[%s4150_s3 + $0x140] sm:$0xff]  ;;  %v1091_v58 = vld [vmem:[%s4150_s3 + $0x170] sm:$0xff] }
  0xc5   : > { %v2384_v53 = vpack.c.bf16 %v1087_v52, %v1085_v51 }
  0xc6   : > { %631 = vmatmul.mubr.f32.gmra.mrb[6].mxu0 %v419_v60  ;;  %2381 = vmatpush1.bf16.msra.mxu1 %v2380_v47  ;;  %v1094_v60 = vld [vmem:[%s4150_s3 + $0x188] sm:$0xff] }
  0xc7   : > { %2325 = vmatpush1.bf16.msra.mxu0 %v2324_v59  ;;  %701 = vmatprep.mubr.f32.mxu0 %v2752_v0  ;;  %v2388_v59 = vpack.c.bf16 %v1091_v58, %v1089_v57 }
  0xc8   : > { %2327 = vmatprep.subr.bf16.mxu0 %v2326_v61  ;;  %2383 = vmatprep.subr.bf16.mxu1 %v2382_v50  ;;  %v1096_v61 = vld [vmem:[%s4150_s3 + $0x198] sm:$0xff] }
  0xc9   : > { %v2390_v62 = vpack.c.bf16 %v1096_v61, %v1094_v60 }
  0xca   : > { %2385 = vmatpush1.bf16.msra.mxu1 %v2384_v53 }
  0xcb   : > { %2329 = vmatpush1.bf16.msra.mxu0 %v2328_v3  ;;  %2387 = vmatprep.subr.bf16.mxu1 %v2386_v56  ;;  %v1098_v3 = vld [vmem:[%s4150_s3 + $0x1a8] sm:$0xff] }
  0xcc   : > { %2331 = vmatprep.subr.bf16.mxu0 %v2330_v4  ;;  %v1100_v4 = vld [vmem:[%s4150_s3 + $0x1b8] sm:$0xff] }
  0xcd   : > { %v2394_v5 = vpack.c.bf16 %v1100_v4, %v1098_v3 }
  0xce   : > { %2389 = vmatpush1.bf16.msra.mxu1 %v2388_v59 }
  0xcf   : > { %2333 = vmatpush1.bf16.msra.mxu0 %v2332_v9  ;;  %2391 = vmatprep.subr.bf16.mxu1 %v2390_v62  ;;  %v1102_v9 = vld [vmem:[%s4150_s3 + $0x1c8] sm:$0xff] }
  0xd0   : > { %2335 = vmatprep.subr.bf16.mxu0 %v2334_v10  ;;  %v1104_v10 = vld [vmem:[%s4150_s3 + $0x1d8] sm:$0xff] }
  0xd1   : > { %v2398_v11 = vpack.c.bf16 %v1104_v10, %v1102_v9 }
  0xd2   : > { %2393 = vmatpush1.bf16.msra.mxu1 %v2392_v2 }
  0xd3   : > { %2337 = vmatpush1.bf16.msra.mxu0 %v2336_v15  ;;  %2395 = vmatprep.subr.bf16.mxu1 %v2394_v5  ;;  %v1106_v15 = vld [vmem:[%s4150_s3 + $0x1e8] sm:$0xff] }
  0xd4   : > { %2339 = vmatprep.subr.bf16.mxu0 %v2338_v16  ;;  %v1108_v16 = vld [vmem:[%s4150_s3 + $0x1f8] sm:$0xff] }
  0xd5   : > { %v2402_v17 = vpack.c.bf16 %v1108_v16, %v1106_v15 }
  0xd6   : > { %2397 = vmatpush1.bf16.msra.mxu1 %v2396_v8 }
  0xd7   : > { %2341 = vmatpush1.bf16.msra.mxu0 %v2340_v19  ;;  %2399 = vmatprep.subr.bf16.mxu1 %v2398_v11  ;;  %v1107_v19 = vld [vmem:[%s4150_s3 + $0x1f0] sm:$0xff] }
  0xda   : > { %702 = vmatmul.mubr.f32.vlgmr.msra.gmra.mrb[0].mxu0 %v432_v20  ;;  %2401 = vmatpush1.bf16.msra.mxu1 %v2400_v14  ;;  %v2404_v20 = vpack.c.bf16 %v1107_v19, %v1105_v18  ;;  %v3473_v14 = vld [vmem:[%s4149_s2] ss:$0 sm:$0xff] }
  0xdb   : > { %707 = vmatprep.mubr.f32.mxu0 %v2752_v0  ;;  %2403 = vmatprep.subr.bf16.mxu1 %v2402_v17 }
  0xde   : > { %708 = vmatmul.mubr.f32.gmra.mrb[2].mxu0 %v433_v21  ;;  %2405 = vmatpush1.bf16.msra.mxu1 %v2404_v20  ;;  %v1110_v21 = vld [vmem:[%s4150_s3 + $0x208] sm:$0xff] }
  0xdf   : > { %713 = vmatprep.mubr.f32.mxu0 %v2752_v0 }
  0xe2   : > { %714 = vmatmul.mubr.f32.gmra.mrb[4].mxu0 %v434_v22  ;;  %v1112_v22 = vld [vmem:[%s4150_s3 + $0x218] sm:$0xff] }
  0xe3   : > { %719 = vmatprep.mubr.f32.mxu0 %v2752_v0 }
  0xe6   : > { %720 = vmatmul.mubr.f32.gmra.mrb[6].mxu0 %v435_v23  ;;  %v2406_v23 = vpack.c.bf16 %v1112_v22, %v1110_v21 }
  0xe8   : > { %2407 = vmatprep.subr.bf16.mxu1 %v2406_v23 }
 0x1ad   : > { %v703_v29 = vpop.f32.mrb[0].mxu0 }
 0x1ae   : > { %v705_v31 = vpop.f32.mrb[1].mxu0 }
 0x1af   : > { %v726_v32 = vmax.f32 %v703_v29, %v705_v31 }
 0x1b1   : > { %v734_v33 = vcombine.high %v726_v32, %v726_v32  ;;  %v741_v34 = vrot.slane %v726_v32, %v3450_v30  ;;  %v709_v35 = vpop.f32.mrb[2].mxu0 }
 0x1b2   : > { %v711_v36 = vpop.f32.mrb[3].mxu0 }
 0x1b3   : > { %v748_v37 = vrot.slane %v734_v33, %v3450_v30  ;;  %v749_v38 = vcombine.high %v741_v34, %v741_v34  ;;  %v819_v39 = vsel %vm818_vm3, %v741_v34, -inf  ;;  %v727_v40 = vmax.f32 %v709_v35, %v711_v36 }
 0x1b4   : > { %v820_v41 = vrot.slane %v819_v39, 4 }
 0x1b5   : > { %v750_v42 = vcombine.high %v748_v37, %v748_v37  ;;  %v826_v43 = vsel %vm818_vm3, %v749_v38, -inf  ;;  %v833_v44 = vsel %vm818_vm3, %v748_v37, -inf  ;;  %v751_v45 = vcombine.high %v727_v40, %v727_v40  ;;  %v715_v46 = vpop.f32.mrb[4].mxu0 }
 0x1b6   : > { %v821_v47 = vmax.f32 %v819_v39, %v820_v41  ;;  %v827_v48 = vrot.slane %v826_v43, 4  ;;  %v834_v49 = vrot.slane %v833_v44, 4  ;;  %v758_v50 = vrot.slane %v727_v40, %v3450_v30  ;;  %v717_v51 = vpop.f32.mrb[5].mxu0 }
 0x1b7   : > { %v840_v52 = vsel %vm818_vm3, %v750_v42, -inf  ;;  %v765_v53 = vrot.slane %v751_v45, %v3450_v30  ;;  %v3460_v54 = vmax.f32 %v715_v46, %v717_v51 }
 0x1b8   : > { %v822_v55 = vrot.slane %v821_v47, 2  ;;  %v828_v56 = vmax.f32 %v826_v43, %v827_v48  ;;  %v835_v57 = vmax.f32 %v833_v44, %v834_v49  ;;  %v841_v58 = vrot.slane %v840_v52, 4 }
 0x1b9   : > { %v766_v59 = vcombine.high %v758_v50, %v758_v50  ;;  %v767_v60 = vcombine.high %v765_v53, %v765_v53  ;;  %v847_v61 = vsel %vm818_vm3, %v758_v50, -inf  ;;  %v861_v62 = vsel %vm818_vm3, %v765_v53, -inf  ;;  %v3464_v63 = vpop.f32.mrb[6].mxu0 }
 0x1ba   : > { %v823_v1 = vmax.f32 %v821_v47, %v822_v55  ;;  %v829_v2 = vrot.slane %v828_v56, 2  ;;  %v836_v3 = vrot.slane %v835_v57, 2  ;;  %v842_v4 = vmax.f32 %v840_v52, %v841_v58  ;;  %v3466_v5 = vpop.f32.mrb[7].mxu0 }
 0x1bb   : > { %v848_v6 = vrot.slane %v847_v61, 4  ;;  %v854_v7 = vsel %vm818_vm3, %v766_v59, -inf  ;;  %v862_v8 = vrot.slane %v861_v62, 4  ;;  %v868_v9 = vsel %vm818_vm3, %v767_v60, -inf }
 0x1bc   : > { %v824_v10 = vrot.slane %v823_v1, 1  ;;  %v830_v11 = vmax.f32 %v828_v56, %v829_v2  ;;  %v837_v12 = vmax.f32 %v835_v57, %v836_v3  ;;  %v843_v13 = vrot.slane %v842_v4, 2 }
 0x1bd   : > { %v849_v15 = vmax.f32 %v847_v61, %v848_v6  ;;  %v855_v16 = vrot.slane %v854_v7, 4  ;;  %v863_v17 = vmax.f32 %v861_v62, %v862_v8  ;;  %v869_v18 = vrot.slane %v868_v9, 4 }
 0x1be   : > { %v825_v19 = vmax.f32 %v823_v1, %v824_v10  ;;  %v831_v20 = vrot.slane %v830_v11, 1  ;;  %v838_v21 = vrot.slane %v837_v12, 1  ;;  %v844_v22 = vmax.f32 %v842_v4, %v843_v13 }
 0x1bf   : > { %v850_v23 = vrot.slane %v849_v15, 2  ;;  %v856_v24 = vmax.f32 %v854_v7, %v855_v16  ;;  %v864_v25 = vrot.slane %v863_v17, 2  ;;  %v870_v27 = vmax.f32 %v868_v9, %v869_v18 }
 0x1c0   : > { %v832_v29 = vmax.f32 %v830_v11, %v831_v20  ;;  %v839_v31 = vmax.f32 %v837_v12, %v838_v21  ;;  %v845_v32 = vrot.slane %v844_v22, 1  ;;  %v938_v33 = vadd.f32 %v3473_v14, %v825_v19 }
 0x1c1   : > { %v851_v34 = vmax.f32 %v849_v15, %v850_v23  ;;  %v857_v35 = vrot.slane %v856_v24, 2  ;;  %v865_v36 = vmax.f32 %v863_v17, %v864_v25  ;;  %v871_v37 = vrot.slane %v870_v27, 2  ;;  %v3503_v23 = vld [vmem:[%s4150_s3 + $0x210] sm:$0xff] }
 0x1c2   : > { %v846_v38 = vmax.f32 %v844_v22, %v845_v32  ;;  %v939_v39 = vadd.f32 %v3473_v14, %v832_v29  ;;  %v940_v40 = vadd.f32 %v3473_v14, %v839_v31  ;;  %v954_v41 = vmax.f32 %v938_v33, 0.0  ;;  %v3498_v22 = vld [vmem:[%s4150_s3 + $0x200] sm:$0xff] }
 0x1c3   : > { %v852_v42 = vrot.slane %v851_v34, 1  ;;  %v858_v43 = vmax.f32 %v856_v24, %v857_v35  ;;  %v866_v44 = vrot.slane %v865_v36, 1  ;;  %v872_v45 = vmax.f32 %v870_v27, %v871_v37 }
 0x1c4   : > { %v941_v46 = vadd.f32 %v3473_v14, %v846_v38  ;;  %v955_v47 = vmax.f32 %v939_v39, 0.0  ;;  %v956_v48 = vmax.f32 %v940_v40, 0.0  ;;  %v768_v49 = vcombine.high %v3460_v54, %v3460_v54  ;;  %v3514_v38 = vld [vmem:[%s4150_s3 + $0x228] sm:$0xff]  ;;  %v3519_v39 = vld [vmem:[%s4150_s3 + $0x238] sm:$0xff] }
 0x1c5   : > { %v853_v50 = vmax.f32 %v851_v34, %v852_v42  ;;  %v859_v51 = vrot.slane %v858_v43, 1  ;;  %v867_v52 = vmax.f32 %v865_v36, %v866_v44  ;;  %v873_v53 = vrot.slane %v872_v45, 1 }
 0x1c6   : > { %v957_v55 = vmax.f32 %v941_v46, 0.0  ;;  %v988_v56 = vrot.slane %v955_v47, 7  ;;  %v991_v57 = vrot.slane %v956_v48, 6  ;;  %v775_v58 = vrot.slane %v3460_v54, %v3450_v30 }
 0x1c7   : > { %v860_v59 = vmax.f32 %v858_v43, %v859_v51  ;;  %v874_v60 = vmax.f32 %v872_v45, %v873_v53  ;;  %v942_v61 = vadd.f32 %v3473_v14, %v853_v50  ;;  %v944_v62 = vadd.f32 %v3473_v14, %v867_v52 }
 0x1c8   : > { %v990_v1 = vsel %vm989_vm4, %v988_v56, %v954_v41  ;;  %v994_v2 = vrot.slane %v957_v55, 5  ;;  %v782_v3 = vrot.slane %v768_v49, %v3450_v30  ;;  %v783_v4 = vcombine.high %v775_v58, %v775_v58 }
 0x1c9   : > { %v993_v6 = vsel %vm992_vm5, %v991_v57, %v990_v1  ;;  %v943_v7 = vadd.f32 %v3473_v14, %v860_v59  ;;  %v945_v8 = vadd.f32 %v3473_v14, %v874_v60  ;;  %v958_v9 = vmax.f32 %v942_v61, 0.0  ;;  %v1113_v59 = vld [vmem:[%s4150_s3 + $0x220] sm:$0xff]  ;;  %v1115_v60 = vld [vmem:[%s4150_s3 + $0x230] sm:$0xff] }
 0x1ca   : > { %v960_v54 = vmax.f32 %v944_v62, 0.0  ;;  %v996_v10 = vsel %vm995_vm6, %v994_v2, %v993_v6  ;;  %v784_v11 = vcombine.high %v782_v3, %v782_v3  ;;  %v875_v12 = vsel %vm818_vm3, %v775_v58, -inf }
 0x1cb   : > { %v959_v13 = vmax.f32 %v943_v7, 0.0  ;;  %v961_v15 = vmax.f32 %v945_v8, 0.0  ;;  %v997_v16 = vrot.slane %v958_v9, 4  ;;  %v876_v17 = vrot.slane %v875_v12, 4 }
 0x1cc   : > { %v1003_v18 = vrot.slane %v960_v54, 2  ;;  %v882_v19 = vsel %vm818_vm3, %v783_v4, -inf  ;;  %v889_v20 = vsel %vm818_vm3, %v782_v3, -inf  ;;  %v896_v21 = vsel %vm818_vm3, %v784_v11, -inf }
 0x1cd   : > { %v999_v24 = vsel %vm998_vm7, %v997_v16, %v996_v10  ;;  %v1000_v25 = vrot.slane %v959_v13, 3  ;;  %v1006_v27 = vrot.slane %v961_v15, 1  ;;  %v877_v29 = vmax.f32 %v875_v12, %v876_v17  ;;  %v1118_v16 = vld [vmem:[%s4150_s3 + $0x248] sm:$0xff]  ;;  %v1120_v17 = vld [vmem:[%s4150_s3 + $0x258] sm:$0xff] }
 0x1ce   : > { %v883_v31 = vrot.slane %v882_v19, 4  ;;  %v890_v32 = vrot.slane %v889_v20, 4  ;;  %v897_v33 = vrot.slane %v896_v21, 4  ;;  %v729_v34 = vmax.f32 %v3464_v63, %v3466_v5 }
 0x1cf   : > { %v1002_v35 = vsel %vm1001_vm8, %v1000_v25, %v999_v24  ;;  %v878_v36 = vrot.slane %v877_v29, 2  ;;  %v2408_v37 = vpack.c.bf16 %v3503_v23, %v3498_v22  ;;  %v2410_v49 = vpack.c.bf16 %v3519_v39, %v3514_v38 }
 0x1d0   : > { %v1005_v40 = vsel %vm1004_vm9, %v1003_v18, %v1002_v35  ;;  %v884_v41 = vmax.f32 %v882_v19, %v883_v31  ;;  %v891_v63 = vmax.f32 %v889_v20, %v890_v32  ;;  %v898_v5 = vmax.f32 %v896_v21, %v897_v33  ;;  %v1119_v31 = vld [vmem:[%s4150_s3 + $0x250] sm:$0xff] }
 0x1d1   : > { %v1008_v42 = vsel %vm1007_vm10, %v1006_v27, %v1005_v40  ;;  %v879_v43 = vmax.f32 %v877_v29, %v878_v36  ;;  %v785_v44 = vcombine.high %v729_v34, %v729_v34  ;;  %v792_v45 = vrot.slane %v729_v34, %v3450_v30  ;;  %v1117_v29 = vld [vmem:[%s4150_s3 + $0x240] sm:$0xff] }
 0x1d2   : > { %1025 = vst [vmem:[#allocation4 + $0x1] sm:$0xff] %v1008_v42  ;;  %v885_v46 = vrot.slane %v884_v41, 2  ;;  %v892_v47 = vrot.slane %v891_v63, 2  ;;  %v899_v48 = vrot.slane %v898_v5, 2  ;;  %1205 = vmatprep.mubr.f32.mxu1 %v1008_v42  ;;  %v2412_v10 = vpack.c.bf16 %v1115_v60, %v1113_v59 }
 0x1d3   : > { %v880_v50 = vrot.slane %v879_v43, 1  ;;  %v799_v51 = vrot.slane %v785_v44, %v3450_v30  ;;  %v800_v52 = vcombine.high %v792_v45, %v792_v45  ;;  %v903_v53 = vsel %vm818_vm3, %v792_v45, -inf  ;;  %v1124_v44 = vld [vmem:[%s4150_s3 + $0x278] sm:$0xff] }
 0x1d4   : > { %v886_v55 = vmax.f32 %v884_v41, %v885_v46  ;;  %v893_v56 = vmax.f32 %v891_v63, %v892_v47  ;;  %v900_v57 = vmax.f32 %v898_v5, %v899_v48  ;;  %v904_v58 = vrot.slane %v903_v53, 4 }
 0x1d5   : > { %v881_v61 = vmax.f32 %v879_v43, %v880_v50  ;;  %v801_v62 = vcombine.high %v799_v51, %v799_v51  ;;  %v910_v1 = vsel %vm818_vm3, %v800_v52, -inf  ;;  %v917_v2 = vsel %vm818_vm3, %v799_v51, -inf  ;;  %v1122_v43 = vld [vmem:[%s4150_s3 + $0x268] sm:$0xff]  ;;  %v1121_v52 = vld [vmem:[%s4150_s3 + $0x260] sm:$0xff] }
 0x1d6   : > { %v887_v3 = vrot.slane %v886_v55, 1  ;;  %v894_v4 = vrot.slane %v893_v56, 1  ;;  %v901_v6 = vrot.slane %v900_v57, 1  ;;  %v905_v7 = vmax.f32 %v903_v53, %v904_v58  ;;  %v1123_v53 = vld [vmem:[%s4150_s3 + $0x270] sm:$0xff] }
 0x1d7   : > { %v911_v8 = vrot.slane %v910_v1, 4  ;;  %v918_v9 = vrot.slane %v917_v2, 4  ;;  %v924_v54 = vsel %vm818_vm3, %v801_v62, -inf  ;;  %v946_v18 = vadd.f32 %v3473_v14, %v881_v61  ;;  %v1126_v62 = vld [vmem:[%s4150_s3 + $0x288] sm:$0xff] }
 0x1d8   : > { %v888_v11 = vmax.f32 %v886_v55, %v887_v3  ;;  %v895_v12 = vmax.f32 %v893_v56, %v894_v4  ;;  %v902_v13 = vmax.f32 %v900_v57, %v901_v6  ;;  %v906_v15 = vrot.slane %v905_v7, 2 }
 0x1d9   : > { %v912_v19 = vmax.f32 %v910_v1, %v911_v8  ;;  %v919_v20 = vmax.f32 %v917_v2, %v918_v9  ;;  %v925_v21 = vrot.slane %v924_v54, 4  ;;  %v1027_v22 = vld [vmem:[#allocation4] sm:$0xff]  ;;  %v2414_v35 = vpack.c.bf16 %v1120_v17, %v1118_v16  ;;  %v1128_v1 = vld [vmem:[%s4150_s3 + $0x298] sm:$0xff] }
 0x1da   : > { %v947_v23 = vadd.f32 %v3473_v14, %v888_v11  ;;  %v948_v24 = vadd.f32 %v3473_v14, %v895_v12  ;;  %v949_v25 = vadd.f32 %v3473_v14, %v902_v13  ;;  %v907_v27 = vmax.f32 %v905_v7, %v906_v15  ;;  %1206 = vmatmul.mubr.f32.vlgmr.msra.gmra.mrb[0].mxu1 %v1027_v22  ;;  %v1127_v11 = vld [vmem:[%s4150_s3 + $0x290] sm:$0xff]  ;;  %v1130_v16 = vld [vmem:[%s4150_s3 + $0x2a8] sm:$0xff]  ;;  %v1132_v17 = vld [vmem:[%s4150_s3 + $0x2b8] sm:$0xff] }
 0x1db   : > { %v913_v32 = vrot.slane %v912_v19, 2  ;;  %v920_v33 = vrot.slane %v919_v20, 2  ;;  %v926_v34 = vmax.f32 %v924_v54, %v925_v21  ;;  %2409 = vmatpush1.bf16.msra.mxu1 %v2408_v37  ;;  %v2416_v42 = vpack.c.bf16 %v1119_v31, %v1117_v29  ;;  %v1134_v29 = vld [vmem:[%s4150_s3 + $0x2c8] sm:$0xff]  ;;  %v1136_v31 = vld [vmem:[%s4150_s3 + $0x2d8] sm:$0xff] }
 0x1dc   : > { %v963_v36 = vmax.f32 %v947_v23, 0.0  ;;  %v964_v38 = vmax.f32 %v948_v24, 0.0  ;;  %v965_v39 = vmax.f32 %v949_v25, 0.0  ;;  %v908_v40 = vrot.slane %v907_v27, 1  ;;  %2411 = vmatprep.subr.bf16.mxu1 %v2410_v49  ;;  %v1131_v24 = vld [vmem:[%s4150_s3 + $0x2b0] sm:$0xff] }
 0x1dd   : > { %v914_v41 = vmax.f32 %v912_v19, %v913_v32  ;;  %v921_v63 = vmax.f32 %v919_v20, %v920_v33  ;;  %v927_v5 = vrot.slane %v926_v34, 2  ;;  %v962_v45 = vmax.f32 %v946_v18, 0.0 }
 0x1de   : > { %v1009_v37 = vrot.slane %v963_v36, 7  ;;  %v1011_v46 = vrot.slane %v964_v38, 6  ;;  %v909_v47 = vmax.f32 %v907_v27, %v908_v40  ;;  %v1013_v48 = vrot.slane %v965_v39, 5  ;;  %v1133_v36 = vld [vmem:[%s4150_s3 + $0x2c0] sm:$0xff]  ;;  %v1135_v38 = vld [vmem:[%s4150_s3 + $0x2d0] sm:$0xff]  ;;  %v1138_v39 = vld [vmem:[%s4150_s3 + $0x2e8] sm:$0xff] }
 0x1df   : > { %v915_v50 = vrot.slane %v914_v41, 1  ;;  %v922_v51 = vrot.slane %v921_v63, 1  ;;  %v928_v49 = vmax.f32 %v926_v34, %v927_v5  ;;  %2413 = vmatpush1.bf16.msra.mxu1 %v2412_v10  ;;  %v2418_v57 = vpack.c.bf16 %v1124_v44, %v1122_v43  ;;  %v1125_v10 = vld [vmem:[%s4150_s3 + $0x280] sm:$0xff]  ;;  %v1140_v40 = vld [vmem:[%s4150_s3 + $0x2f8] sm:$0xff] }
 0x1e0   : > { %v1010_v55 = vsel %vm989_vm4, %v1009_v37, %v962_v45  ;;  %v950_v56 = vadd.f32 %v3473_v14, %v909_v47  ;;  %2415 = vmatprep.subr.bf16.mxu1 %v2414_v35  ;;  %v2420_v3 = vpack.c.bf16 %v1123_v53, %v1121_v52  ;;  %v2422_v54 = vpack.c.bf16 %v1128_v1, %v1126_v62  ;;  %v1137_v5 = vld [vmem:[%s4150_s3 + $0x2e0] sm:$0xff]  ;;  %v1450_v47 = vld [vmem:[%s4152_s5 + $0x88] sm:$0xff]  ;;  %v1484_v1 = vld [vmem:[%s4152_s5 + $0x198] sm:$0xff] }
 0x1e1   : > { %v1012_v58 = vsel %vm992_vm5, %v1011_v46, %v1010_v55  ;;  %v916_v59 = vmax.f32 %v914_v41, %v915_v50  ;;  %v923_v60 = vmax.f32 %v921_v63, %v922_v51  ;;  %v929_v61 = vrot.slane %v928_v49, 1  ;;  %v1449_v46 = vld [vmem:[%s4152_s5 + $0x80] sm:$0xff]  ;;  %v1482_v51 = vld [vmem:[%s4152_s5 + $0x188] sm:$0xff] }
 0x1e2   : > { %v966_v2 = vmax.f32 %v950_v56, 0.0  ;;  %v1014_v8 = vsel %vm995_vm6, %v1013_v48, %v1012_v58  ;;  %v2424_v22 = vpack.c.bf16 %v1127_v11, %v1125_v10  ;;  %v2426_v23 = vpack.c.bf16 %v1132_v17, %v1130_v16  ;;  %v1481_v48 = vld [vmem:[%s4152_s5 + $0x180] sm:$0xff]  ;;  %v1434_v52 = vld [vmem:[%s4152_s5 + $0x8] sm:$0xff] }
 0x1e3   : > { %v930_v4 = vmax.f32 %v928_v49, %v929_v61  ;;  %v951_v6 = vadd.f32 %v3473_v14, %v916_v59  ;;  %v952_v7 = vadd.f32 %v3473_v14, %v923_v60  ;;  %2417 = vmatpush1.bf16.msra.mxu1 %v2416_v42  ;;  %v2430_v35 = vpack.c.bf16 %v1136_v31, %v1134_v29  ;;  %v1139_v42 = vld [vmem:[%s4150_s3 + $0x2f0] sm:$0xff]  ;;  %v1433_v49 = vld [vmem:[%s4152_s5] sm:$0xff]  ;;  %v1452_v60 = vld [vmem:[%s4152_s5 + $0x98] sm:$0xff] }
 0x1e4   : > { %v1015_v9 = vrot.slane %v966_v2, 4  ;;  %2419 = vmatprep.subr.bf16.mxu1 %v2418_v57  ;;  %v2432_v41 = vpack.c.bf16 %v1135_v38, %v1133_v36  ;;  %v2434_v63 = vpack.c.bf16 %v1140_v40, %v1138_v39  ;;  %v2436_v44 = vpack.c.bf16 %v1139_v42, %v1137_v5  ;;  %v1465_v56 = vld [vmem:[%s4152_s5 + $0x100] sm:$0xff]  ;;  %v1466_v57 = vld [vmem:[%s4152_s5 + $0x108] sm:$0xff]  ;;  %v1451_v59 = vld [vmem:[%s4152_s5 + $0x90] sm:$0xff] }
 0x1e5   : > { %v953_v12 = vadd.f32 %v3473_v14, %v930_v4  ;;  %v967_v13 = vmax.f32 %v951_v6, 0.0  ;;  %v968_v15 = vmax.f32 %v952_v7, 0.0  ;;  %v1129_v14 = vld [vmem:[%s4150_s3 + $0x2a0] sm:$0xff]  ;;  %v2438_v50 = vpack.c.bf16 %v1450_v47, %v1449_v46  ;;  %v1483_v61 = vld [vmem:[%s4152_s5 + $0x190] sm:$0xff]  ;;  %v1454_v10 = vld [vmem:[%s4152_s5 + $0xa8] sm:$0xff] }
 0x1e6   : > { %v1016_v18 = vsel %vm998_vm7, %v1015_v9, %v1014_v8  ;;  %v2428_v34 = vpack.c.bf16 %v1131_v24, %v1129_v14  ;;  %v2470_v53 = vpack.c.bf16 %v1482_v51, %v1481_v48  ;;  %v2440_v55 = vpack.c.bf16 %v1434_v52, %v1433_v49  ;;  %v1435_v2 = vld [vmem:[%s4152_s5 + $0x10] sm:$0xff]  ;;  %v1468_v8 = vld [vmem:[%s4152_s5 + $0x118] sm:$0xff]  ;;  %v1485_v11 = vld [vmem:[%s4152_s5 + $0x1a0] sm:$0xff] }
 0x1e7   : > { %v969_v19 = vmax.f32 %v953_v12, 0.0  ;;  %v1017_v20 = vrot.slane %v967_v13, 3  ;;  %v1019_v21 = vrot.slane %v968_v15, 2  ;;  %2421 = vmatpush1.bf16.msra.mxu1 %v2420_v3  ;;  %2439 = vmatprep.subr.bf16.mxu0 %v2438_v50  ;;  %v2472_v58 = vpack.c.bf16 %v1466_v57, %v1465_v56  ;;  %v1436_v3 = vld [vmem:[%s4152_s5 + $0x18] sm:$0xff]  ;;  %v1467_v7 = vld [vmem:[%s4152_s5 + $0x110] sm:$0xff]  ;;  %v1486_v13 = vld [vmem:[%s4152_s5 + $0x1a8] sm:$0xff] }
 0x1e8   : > { %2423 = vmatprep.subr.bf16.mxu1 %v2422_v54  ;;  %2441 = vmatpush3.bf16.msra.mxu0 %v2440_v55  ;;  %v2442_v62 = vpack.c.bf16 %v1452_v60, %v1451_v59  ;;  %v2474_v4 = vpack.c.bf16 %v1484_v1, %v1483_v61  ;;  %v2444_v6 = vpack.c.bf16 %v1436_v3, %v1435_v2  ;;  %v1453_v54 = vld [vmem:[%s4152_s5 + $0xa0] sm:$0xff]  ;;  %v1438_v16 = vld [vmem:[%s4152_s5 + $0x28] sm:$0xff]  ;;  %v1487_v14 = vld [vmem:[%s4152_s5 + $0x1b0] sm:$0xff] }
 0x1e9   : > { %v1018_v25 = vsel %vm1001_vm8, %v1017_v20, %v1016_v18  ;;  %v1021_v27 = vrot.slane %v969_v19, 1  ;;  %v2476_v9 = vpack.c.bf16 %v1468_v8, %v1467_v7  ;;  %v2446_v12 = vpack.c.bf16 %v1454_v10, %v1453_v54  ;;  %v1437_v15 = vld [vmem:[%s4152_s5 + $0x20] sm:$0xff]  ;;  %v1470_v20 = vld [vmem:[%s4152_s5 + $0x128] sm:$0xff]  ;;  %v1488_v24 = vld [vmem:[%s4152_s5 + $0x1b8] sm:$0xff] }
 0x1ea   : > { %v1020_v32 = vsel %vm1004_vm9, %v1019_v21, %v1018_v25  ;;  %2443 = vmatprep.subr.bf16.mxu0 %v2442_v62  ;;  %v2478_v17 = vpack.c.bf16 %v1486_v13, %v1485_v11  ;;  %v2448_v18 = vpack.c.bf16 %v1438_v16, %v1437_v15  ;;  %v1469_v19 = vld [vmem:[%s4152_s5 + $0x120] sm:$0xff]  ;;  %v1455_v21 = vld [vmem:[%s4152_s5 + $0xb0] sm:$0xff]  ;;  %v1440_v31 = vld [vmem:[%s4152_s5 + $0x38] sm:$0xff] }
 0x1eb   : > { %v1022_v33 = vsel %vm1007_vm10, %v1021_v27, %v1020_v32  ;;  %2425 = vmatpush1.bf16.msra.mxu1 %v2424_v22  ;;  %v2480_v22 = vpack.c.bf16 %v1470_v20, %v1469_v19  ;;  %v2482_v27 = vpack.c.bf16 %v1488_v24, %v1487_v14  ;;  %v1439_v29 = vld [vmem:[%s4152_s5 + $0x30] sm:$0xff]  ;;  %v1458_v36 = vld [vmem:[%s4152_s5 + $0xc8] sm:$0xff]  ;;  %v1489_v40 = vld [vmem:[%s4152_s5 + $0x1c0] sm:$0xff] }
 0x1ec   : > { %1026 = vst [vmem:[#allocation4 + $0x9] sm:$0xff] %v1022_v33  ;;  %1211 = vmatprep.mubr.f32.mxu1 %v1022_v33  ;;  %2427 = vmatprep.subr.bf16.mxu1 %v2426_v23  ;;  %v1456_v23 = vld [vmem:[%s4152_s5 + $0xb8] sm:$0xff]  ;;  %v1471_v32 = vld [vmem:[%s4152_s5 + $0x130] sm:$0xff]  ;;  %v2452_v33 = vpack.c.bf16 %v1440_v31, %v1439_v29  ;;  %v1442_v42 = vld [vmem:[%s4152_s5 + $0x48] sm:$0xff] }
 0x1ed   : > { %2445 = vmatpush3.bf16.msra.mxu0 %v2444_v6  ;;  %v2450_v25 = vpack.c.bf16 %v1456_v23, %v1455_v21  ;;  %v1460_v46 = vld [vmem:[%s4152_s5 + $0xd8] sm:$0xff]  ;;  %v1491_v47 = vld [vmem:[%s4152_s5 + $0x1d0] sm:$0xff]  ;;  %v1461_v57 = vld [vmem:[%s4152_s5 + $0xe0] sm:$0xff] }
 0x1ee   : > { %2447 = vmatprep.subr.bf16.mxu0 %v2446_v12  ;;  %v1492_v51 = vld [vmem:[%s4152_s5 + $0x1d8] sm:$0xff]  ;;  %v1443_v49 = vld [vmem:[%s4152_s5 + $0x50] sm:$0xff]  ;;  %v1493_v59 = vld [vmem:[%s4152_s5 + $0x1e0] sm:$0xff] }
 0x1ef   : > { %2429 = vmatpush1.bf16.msra.mxu1 %v2428_v34  ;;  %v1472_v34 = vld [vmem:[%s4152_s5 + $0x138] sm:$0xff]  ;;  %v1475_v55 = vld [vmem:[%s4152_s5 + $0x150] sm:$0xff]  ;;  %v1494_v60 = vld [vmem:[%s4152_s5 + $0x1e8] sm:$0xff] }
 0x1f0   : > { %2431 = vmatprep.subr.bf16.mxu1 %v2430_v35  ;;  %v1457_v35 = vld [vmem:[%s4152_s5 + $0xc0] sm:$0xff]  ;;  %v2484_v38 = vpack.c.bf16 %v1472_v34, %v1471_v32  ;;  %v1444_v52 = vld [vmem:[%s4152_s5 + $0x58] sm:$0xff]  ;;  %v1446_v3 = vld [vmem:[%s4152_s5 + $0x68] sm:$0xff]  ;;  %v2494_v6 = vpack.c.bf16 %v1494_v60, %v1493_v59 }
 0x1f1   : > { %2449 = vmatpush3.bf16.msra.mxu0 %v2448_v18  ;;  %v2454_v39 = vpack.c.bf16 %v1458_v36, %v1457_v35  ;;  %v1476_v56 = vld [vmem:[%s4152_s5 + $0x158] sm:$0xff]  ;;  %v2460_v61 = vpack.c.bf16 %v1444_v52, %v1443_v49  ;;  %v1445_v2 = vld [vmem:[%s4152_s5 + $0x60] sm:$0xff]  ;;  %v1478_v7 = vld [vmem:[%s4152_s5 + $0x168] sm:$0xff] }
 0x1f2   : > { %2451 = vmatprep.subr.bf16.mxu0 %v2450_v25  ;;  %v2492_v62 = vpack.c.bf16 %v1476_v56, %v1475_v55  ;;  %v1463_v8 = vld [vmem:[%s4152_s5 + $0xf0] sm:$0xff]  ;;  %v1496_v10 = vld [vmem:[%s4152_s5 + $0x1f8] sm:$0xff]  ;;  %v2464_v11 = vpack.c.bf16 %v1446_v3, %v1445_v2  ;;  %v1513_v20 = vld [vmem:[%s4152_s5 + $0x280] sm:$0xff] }
 0x1f3   : > { %v1028_v43 = vld [vmem:[#allocation4 + $0x8] sm:$0xff]  ;;  %2433 = vmatpush1.bf16.msra.mxu1 %v2432_v41  ;;  %v1490_v41 = vld [vmem:[%s4152_s5 + $0x1c8] sm:$0xff]  ;;  %v1448_v16 = vld [vmem:[%s4152_s5 + $0x78] sm:$0xff] }
 0x1f4   : > { %1212 = vmatmul.mubr.f32.gmra.mrb[2].mxu1 %v1028_v43  ;;  %2435 = vmatprep.subr.bf16.mxu1 %v2434_v63  ;;  %v1035_v45 = vld [vmem:[#allocation4 + $0x2] sm:$0xff]  ;;  %v1036_v37 = vld [vmem:[#allocation4 + $0xa] sm:$0xff]  ;;  %v1441_v63 = vld [vmem:[%s4152_s5 + $0x40] sm:$0xff]  ;;  %v2486_v5 = vpack.c.bf16 %v1490_v41, %v1489_v40 }
 0x1f5   : > { %1282 = vmatprep.mubr.f32.mxu1 %v2752_v0  ;;  %v1473_v43 = vld [vmem:[%s4152_s5 + $0x140] sm:$0xff]  ;;  %2453 = vmatpush3.bf16.msra.mxu0 %v2452_v33  ;;  %v1495_v54 = vld [vmem:[%s4152_s5 + $0x1f0] sm:$0xff]  ;;  %v1480_v19 = vld [vmem:[%s4152_s5 + $0x178] sm:$0xff] }
 0x1f6   : > { %2455 = vmatprep.subr.bf16.mxu0 %v2454_v39  ;;  %v1447_v15 = vld [vmem:[%s4152_s5 + $0x70] sm:$0xff]  ;;  %v2498_v18 = vpack.c.bf16 %v1496_v10, %v1495_v54  ;;  %v1514_v21 = vld [vmem:[%s4152_s5 + $0x288] sm:$0xff]  ;;  %v1529_v55 = vld [vmem:[%s4152_s5 + $0x300] sm:$0xff] }
 0x1f7   : > { %2437 = vmatpush1.bf16.msra.mxu1 %v2436_v44  ;;  %v1474_v44 = vld [vmem:[%s4152_s5 + $0x148] sm:$0xff]  ;;  %v2468_v14 = vpack.c.bf16 %v1448_v16, %v1447_v15  ;;  %v2502_v25 = vpack.c.bf16 %v1514_v21, %v1513_v20 }
 0x1f8   : > { %2471 = vmatprep.subr.bf16.mxu1 %v2470_v53  ;;  %v2488_v48 = vpack.c.bf16 %v1474_v44, %v1473_v43  ;;  %v2490_v53 = vpack.c.bf16 %v1492_v51, %v1491_v47  ;;  %v1546_v23 = vld [vmem:[%s4152_s5 + $0x388] sm:$0xff] }
 0x1fa   : > { %1283 = vmatmul.mubr.f32.vlgmr.msra.gmra.mrb[0].mxu1 %v1035_v45  ;;  %v2456_v45 = vpack.c.bf16 %v1442_v42, %v1441_v63 }
 0x1fb   : > { %1288 = vmatprep.mubr.f32.mxu1 %v2752_v0  ;;  %2473 = vmatpush3.bf16.msra.mxu1 %v2472_v58  ;;  %v1462_v58 = vld [vmem:[%s4152_s5 + $0xe8] sm:$0xff] }
 0x1fc   : > { %2475 = vmatprep.subr.bf16.mxu1 %v2474_v4  ;;  %2457 = vmatpush3.bf16.msra.mxu0 %v2456_v45  ;;  %v2462_v1 = vpack.c.bf16 %v1462_v58, %v1461_v57  ;;  %v1477_v4 = vld [vmem:[%s4152_s5 + $0x160] sm:$0xff] }
 0x1fd   : > { %v2496_v12 = vpack.c.bf16 %v1478_v7, %v1477_v4 }
 0x1fe   : > { %1289 = vmatmul.mubr.f32.gmra.mrb[2].mxu1 %v1036_v37  ;;  %v1459_v37 = vld [vmem:[%s4152_s5 + $0xd0] sm:$0xff] }
 0x1ff   : > { %2477 = vmatpush3.bf16.msra.mxu1 %v2476_v9  ;;  %v2458_v50 = vpack.c.bf16 %v1460_v46, %v1459_v37  ;;  %v1464_v9 = vld [vmem:[%s4152_s5 + $0xf8] sm:$0xff] }
 0x200   : > { %2479 = vmatprep.subr.bf16.mxu1 %v2478_v17  ;;  %v2466_v13 = vpack.c.bf16 %v1464_v9, %v1463_v8  ;;  %v1479_v17 = vld [vmem:[%s4152_s5 + $0x170] sm:$0xff]  ;;  %v2073_v9 = vld [vmem:[%s4151_s4] ss:$0 sm:$0xff] }
 0x201   : > { %2459 = vmatprep.subr.bf16.mxu0 %v2458_v50  ;;  %v2500_v24 = vpack.c.bf16 %v1480_v19, %v1479_v17 }
 0x202   : > { %2461 = vmatpush3.bf16.msra.mxu0 %v2460_v61 }
 0x203   : > { %2481 = vmatpush3.bf16.msra.mxu1 %v2480_v22  ;;  %2463 = vmatprep.subr.bf16.mxu0 %v2462_v1  ;;  %v1545_v22 = vld [vmem:[%s4152_s5 + $0x380] sm:$0xff] }
 0x204   : > { %2483 = vmatprep.subr.bf16.mxu1 %v2482_v27  ;;  %v2534_v27 = vpack.c.bf16 %v1546_v23, %v1545_v22 }
 0x206   : > { %2465 = vmatpush3.bf16.msra.mxu0 %v2464_v11 }
 0x207   : > { %2485 = vmatpush3.bf16.msra.mxu1 %v2484_v38  ;;  %2467 = vmatprep.subr.bf16.mxu0 %v2466_v13 }
 0x208   : > { %2487 = vmatprep.subr.bf16.mxu1 %v2486_v5 }
 0x20a   : > { %2469 = vmatpush3.bf16.msra.mxu0 %v2468_v14 }
 0x20b   : > { %2489 = vmatpush3.bf16.msra.mxu1 %v2488_v48  ;;  %2503 = vmatprep.subr.bf16.mxu0 %v2502_v25 }
 0x20c   : > { %2491 = vmatprep.subr.bf16.mxu1 %v2490_v53 }
 0x20f   : > { %2493 = vmatpush3.bf16.msra.mxu1 %v2492_v62 }
 0x210   : > { %2495 = vmatprep.subr.bf16.mxu1 %v2494_v6 }
 0x213   : > { %2497 = vmatpush3.bf16.msra.mxu1 %v2496_v12 }
 0x214   : > { %2499 = vmatprep.subr.bf16.mxu1 %v2498_v18 }
 0x217   : > { %2501 = vmatpush3.bf16.msra.mxu1 %v2500_v24 }
 0x218   : > { %2535 = vmatprep.subr.bf16.mxu1 %v2534_v27 }
 0x2cd   : > { %v1284_v29 = vpop.f32.mrb[0].mxu1 }
 0x2ce   : > { %v1286_v31 = vpop.f32.mrb[1].mxu1 }
 0x2cf   : > { %v1295_v32 = vmax.f32 %v1284_v29, %v1286_v31 }
 0x2d1   : > { %v1299_v33 = vcombine.high %v1295_v32, %v1295_v32  ;;  %v1306_v34 = vrot.slane %v1295_v32, %v3450_v30  ;;  %v1290_v35 = vpop.f32.mrb[2].mxu1 }
 0x2d2   : > { %v1292_v36 = vpop.f32.mrb[3].mxu1 }
 0x2d3   : > { %v1313_v38 = vrot.slane %v1299_v33, %v3450_v30  ;;  %v1314_v39 = vcombine.high %v1306_v34, %v1306_v34  ;;  %v1341_v40 = vsel %vm818_vm3, %v1306_v34, -inf  ;;  %v1296_v41 = vmax.f32 %v1290_v35, %v1292_v36 }
 0x2d4   : > { %v1342_v63 = vrot.slane %v1341_v40, 4 }
 0x2d5   : > { %v1315_v5 = vcombine.high %v1313_v38, %v1313_v38  ;;  %v1348_v42 = vsel %vm818_vm3, %v1314_v39, -inf  ;;  %v1355_v43 = vsel %vm818_vm3, %v1313_v38, -inf  ;;  %v1316_v44 = vcombine.high %v1296_v41, %v1296_v41 }
 0x2d6   : > { %v1343_v45 = vmax.f32 %v1341_v40, %v1342_v63  ;;  %v1349_v37 = vrot.slane %v1348_v42, 4  ;;  %v1356_v46 = vrot.slane %v1355_v43, 4  ;;  %v1323_v47 = vrot.slane %v1296_v41, %v3450_v30 }
 0x2d7   : > { %v1362_v48 = vsel %vm818_vm3, %v1315_v5, -inf  ;;  %v1330_v50 = vrot.slane %v1316_v44, %v3450_v30 }
 0x2d8   : > { %v1344_v51 = vrot.slane %v1343_v45, 2  ;;  %v1350_v49 = vmax.f32 %v1348_v42, %v1349_v37  ;;  %v1357_v52 = vmax.f32 %v1355_v43, %v1356_v46  ;;  %v1363_v53 = vrot.slane %v1362_v48, 4 }
 0x2d9   : > { %v1331_v56 = vcombine.high %v1323_v47, %v1323_v47  ;;  %v1332_v57 = vcombine.high %v1330_v50, %v1330_v50  ;;  %v1369_v58 = vsel %vm818_vm3, %v1323_v47, -inf  ;;  %v1383_v59 = vsel %vm818_vm3, %v1330_v50, -inf }
 0x2da   : > { %v1345_v60 = vmax.f32 %v1343_v45, %v1344_v51  ;;  %v1351_v61 = vrot.slane %v1350_v49, 2  ;;  %v1358_v62 = vrot.slane %v1357_v52, 2  ;;  %v1364_v1 = vmax.f32 %v1362_v48, %v1363_v53 }
 0x2db   : > { %v1370_v30 = vrot.slane %v1369_v58, 4  ;;  %v1376_v2 = vsel %vm818_vm3, %v1331_v56, -inf  ;;  %v1384_v3 = vrot.slane %v1383_v59, 4  ;;  %v1390_v4 = vsel %vm818_vm3, %v1332_v57, -inf }
 0x2dc   : > { %v1346_v26 = vrot.slane %v1345_v60, 1  ;;  %v1352_v6 = vmax.f32 %v1350_v49, %v1351_v61  ;;  %v1359_v7 = vmax.f32 %v1357_v52, %v1358_v62  ;;  %v1365_v8 = vrot.slane %v1364_v1, 2 }
 0x2dd   : > { %v1371_v54 = vmax.f32 %v1369_v58, %v1370_v30  ;;  %v1377_v10 = vrot.slane %v1376_v2, 4  ;;  %v1385_v11 = vmax.f32 %v1383_v59, %v1384_v3  ;;  %v1391_v12 = vrot.slane %v1390_v4, 4  ;;  %v1497_v59 = vld [vmem:[%s4152_s5 + $0x200] sm:$0xff]  ;;  %v1530_v30 = vld [vmem:[%s4152_s5 + $0x308] sm:$0xff]  ;;  %v1516_v3 = vld [vmem:[%s4152_s5 + $0x298] sm:$0xff] }
 0x2de   : > { %v1347_v13 = vmax.f32 %v1345_v60, %v1346_v26  ;;  %v1353_v15 = vrot.slane %v1352_v6, 1  ;;  %v1360_v16 = vrot.slane %v1359_v7, 1  ;;  %v1366_v17 = vmax.f32 %v1364_v1, %v1365_v8  ;;  %v1498_v1 = vld [vmem:[%s4152_s5 + $0x208] sm:$0xff] }
 0x2df   : > { %v1372_v18 = vrot.slane %v1371_v54, 2  ;;  %v1378_v19 = vmax.f32 %v1376_v2, %v1377_v10  ;;  %v1386_v20 = vrot.slane %v1385_v11, 2  ;;  %v1392_v21 = vmax.f32 %v1390_v4, %v1391_v12  ;;  %v1515_v2 = vld [vmem:[%s4152_s5 + $0x290] sm:$0xff] }
 0x2e0   : > { %v1354_v22 = vmax.f32 %v1352_v6, %v1353_v15  ;;  %v1361_v23 = vmax.f32 %v1359_v7, %v1360_v16  ;;  %v1367_v14 = vrot.slane %v1366_v17, 1  ;;  %v1404_v24 = vadd.f32 %v2073_v9, %v1347_v13  ;;  %v1499_v15 = vld [vmem:[%s4152_s5 + $0x210] sm:$0xff]  ;;  %v1500_v16 = vld [vmem:[%s4152_s5 + $0x218] sm:$0xff] }
 0x2e1   : > { %v1373_v25 = vmax.f32 %v1371_v54, %v1372_v18  ;;  %v1379_v27 = vrot.slane %v1378_v19, 2  ;;  %v1387_v29 = vmax.f32 %v1385_v11, %v1386_v20  ;;  %v1393_v31 = vrot.slane %v1392_v21, 2  ;;  %v1548_v54 = vld [vmem:[%s4152_s5 + $0x398] sm:$0xff] }
 0x2e2   : > { %v1368_v32 = vmax.f32 %v1366_v17, %v1367_v14  ;;  %v1405_v33 = vadd.f32 %v2073_v9, %v1354_v22  ;;  %v1406_v34 = vadd.f32 %v2073_v9, %v1361_v23  ;;  %v1412_v35 = vmax.f32 %v1404_v24, 0.0  ;;  %v1531_v17 = vld [vmem:[%s4152_s5 + $0x310] sm:$0xff]  ;;  %v1532_v18 = vld [vmem:[%s4152_s5 + $0x318] sm:$0xff]  ;;  %v1518_v22 = vld [vmem:[%s4152_s5 + $0x2a8] sm:$0xff] }
 0x2e3   : > { %v1374_v36 = vrot.slane %v1373_v25, 1  ;;  %v1380_v38 = vmax.f32 %v1378_v19, %v1379_v27  ;;  %v1388_v39 = vrot.slane %v1387_v29, 1  ;;  %v1394_v40 = vmax.f32 %v1392_v21, %v1393_v31  ;;  %v1517_v19 = vld [vmem:[%s4152_s5 + $0x2a0] sm:$0xff]  ;;  %v1550_v14 = vld [vmem:[%s4152_s5 + $0x3a8] sm:$0xff] }
 0x2e4   : > { %v1407_v41 = vadd.f32 %v2073_v9, %v1368_v32  ;;  %v1413_v63 = vmax.f32 %v1405_v33, 0.0  ;;  %v1414_v5 = vmax.f32 %v1406_v34, 0.0  ;;  %1424 = vst.msk [vmem:[#allocation6] sm:$0x1] %vm3839_vm11, %v1412_v35  ;;  %v1569_v58 = vsub.s32 1, %v3447_v28  ;;  %v1549_v23 = vld [vmem:[%s4152_s5 + $0x3a0] sm:$0xff] }
 0x2e5   : > { %v1375_v42 = vmax.f32 %v1373_v25, %v1374_v36  ;;  %v1381_v43 = vrot.slane %v1380_v38, 1  ;;  %v1389_v44 = vmax.f32 %v1387_v29, %v1388_v39  ;;  %v1395_v45 = vrot.slane %v1394_v40, 1  ;;  %v1501_v31 = vld [vmem:[%s4152_s5 + $0x220] sm:$0xff]  ;;  %v1502_v32 = vld [vmem:[%s4152_s5 + $0x228] sm:$0xff]  ;;  %v1520_v39 = vld [vmem:[%s4152_s5 + $0x2b8] sm:$0xff] }
 0x2e6   : > { %v1415_v37 = vmax.f32 %v1407_v41, 0.0  ;;  %1425 = vst.msk [vmem:[#allocation6 + $0x1] sm:$0x1] %vm3839_vm11, %v1413_v63  ;;  %1426 = vst.msk [vmem:[#allocation6 + $0x2] sm:$0x1] %vm3839_vm11, %v1414_v5  ;;  %v1577_v60 = vsub.s32 3, %v3447_v28  ;;  %v2504_v26 = vpack.c.bf16 %v1498_v1, %v1497_v59  ;;  %v2536_v6 = vpack.c.bf16 %v1530_v30, %v1529_v55 }
 0x2e7   : > { %v1382_v46 = vmax.f32 %v1380_v38, %v1381_v43  ;;  %v1396_v47 = vmax.f32 %v1394_v40, %v1395_v45  ;;  %v1408_v48 = vadd.f32 %v2073_v9, %v1375_v42  ;;  %v1410_v50 = vadd.f32 %v2073_v9, %v1389_v44  ;;  %v1533_v35 = vld [vmem:[%s4152_s5 + $0x320] sm:$0xff]  ;;  %v1534_v36 = vld [vmem:[%s4152_s5 + $0x328] sm:$0xff]  ;;  %v1519_v38 = vld [vmem:[%s4152_s5 + $0x2b0] sm:$0xff] }
 0x2e8   : > { %1427 = vst.msk [vmem:[#allocation6 + $0x3] sm:$0x1] %vm3839_vm11, %v1415_v37  ;;  %v1565_v61 = vsub.s32 0, %v3447_v28  ;;  %v1573_v62 = vsub.s32 2, %v3447_v28  ;;  %v1585_v7 = vsub.s32 5, %v3447_v28  ;;  %v1593_v8 = vsub.s32 7, %v3447_v28 }
 0x2e9   : > { %v1409_v51 = vadd.f32 %v2073_v9, %v1382_v46  ;;  %v1411_v49 = vadd.f32 %v2073_v9, %v1396_v47  ;;  %v1416_v52 = vmax.f32 %v1408_v48, 0.0  ;;  %v1418_v53 = vmax.f32 %v1410_v50, 0.0  ;;  %v1547_v9 = vld [vmem:[%s4152_s5 + $0x390] sm:$0xff]  ;;  %v1552_v41 = vld [vmem:[%s4152_s5 + $0x3b8] sm:$0xff]  ;;  %v1521_v47 = vld [vmem:[%s4152_s5 + $0x2c0] sm:$0xff] }
 0x2ea   : > { %v2506_v20 = vpack.c.bf16 %v1516_v3, %v1515_v2  ;;  %v2538_v21 = vpack.c.bf16 %v1548_v54, %v1547_v9  ;;  %v2508_v27 = vpack.c.bf16 %v1500_v16, %v1499_v15  ;;  %v2540_v29 = vpack.c.bf16 %v1532_v18, %v1531_v17  ;;  %v1551_v40 = vld [vmem:[%s4152_s5 + $0x3b0] sm:$0xff]  ;;  %v1504_v43 = vld [vmem:[%s4152_s5 + $0x238] sm:$0xff]  ;;  %v1522_v48 = vld [vmem:[%s4152_s5 + $0x2c8] sm:$0xff] }
 0x2eb   : > { %v1417_v56 = vmax.f32 %v1409_v51, 0.0  ;;  %v1419_v57 = vmax.f32 %v1411_v49, 0.0  ;;  %1428 = vst.msk [vmem:[#allocation6 + $0x4] sm:$0x1] %vm3839_vm11, %v1416_v52  ;;  %1430 = vst.msk [vmem:[#allocation6 + $0x6] sm:$0x1] %vm3839_vm11, %v1418_v53  ;;  %v2510_v33 = vpack.c.bf16 %v1518_v22, %v1517_v19  ;;  %v2542_v34 = vpack.c.bf16 %v1550_v14, %v1549_v23 }
 0x2ec   : > { %v2512_v63 = vpack.c.bf16 %v1502_v32, %v1501_v31  ;;  %v2544_v5 = vpack.c.bf16 %v1534_v36, %v1533_v35  ;;  %v1503_v42 = vld [vmem:[%s4152_s5 + $0x230] sm:$0xff]  ;;  %v2514_v44 = vpack.c.bf16 %v1520_v39, %v1519_v38  ;;  %v2546_v45 = vpack.c.bf16 %v1552_v41, %v1551_v40  ;;  %v1536_v46 = vld [vmem:[%s4152_s5 + $0x338] sm:$0xff]  ;;  %v1553_v50 = vld [vmem:[%s4152_s5 + $0x3c0] sm:$0xff] }
 0x2ed   : > { %1429 = vst.msk [vmem:[#allocation6 + $0x5] sm:$0x1] %vm3839_vm11, %v1417_v56  ;;  %1431 = vst.msk [vmem:[#allocation6 + $0x7] sm:$0x1] %vm3839_vm11, %v1419_v57  ;;  %v1535_v37 = vld [vmem:[%s4152_s5 + $0x330] sm:$0xff]  ;;  %v1554_v51 = vld [vmem:[%s4152_s5 + $0x3c8] sm:$0xff]  ;;  %v2516_v49 = vpack.c.bf16 %v1504_v43, %v1503_v42  ;;  %v2518_v57 = vpack.c.bf16 %v1522_v48, %v1521_v47 }
 0x2ee   : > { %v2548_v52 = vpack.c.bf16 %v1536_v46, %v1535_v37  ;;  %v1505_v53 = vld [vmem:[%s4152_s5 + $0x240] sm:$0xff]  ;;  %v1506_v56 = vld [vmem:[%s4152_s5 + $0x248] sm:$0xff]  ;;  %v1555_v1 = vld [vmem:[%s4152_s5 + $0x3d0] sm:$0xff]  ;;  %v1581_v39 = vsub.s32 4, %v3447_v28  ;;  %v1589_v40 = vsub.s32 6, %v3447_v28  ;;  %v2756_v43 = vmov 0.0|0.0  }
 0x2ef   : > { %v1537_v59 = vld [vmem:[%s4152_s5 + $0x340] sm:$0xff]  ;;  %v1556_v55 = vld [vmem:[%s4152_s5 + $0x3d8] sm:$0xff]  ;;  %v2520_v30 = vpack.c.bf16 %v1506_v56, %v1505_v53  ;;  %v1507_v3 = vld [vmem:[%s4152_s5 + $0x250] sm:$0xff] }
 0x2f0   : > { %v1540_v9 = vld [vmem:[%s4152_s5 + $0x358] sm:$0xff]  ;;  %v1525_v54 = vld [vmem:[%s4152_s5 + $0x2e0] sm:$0xff]  ;;  %v1510_v17 = vld [vmem:[%s4152_s5 + $0x268] sm:$0xff] }
 0x2f1   : > { %v1509_v16 = vld [vmem:[%s4152_s5 + $0x260] sm:$0xff]  ;;  %v1527_v22 = vld [vmem:[%s4152_s5 + $0x2f0] sm:$0xff]  ;;  %v1528_v23 = vld [vmem:[%s4152_s5 + $0x2f8] sm:$0xff] }
 0x2f2   : > { %v1559_v14 = vld [vmem:[%s4152_s5 + $0x3f0] sm:$0xff]  ;;  %v2530_v31 = vpack.c.bf16 %v1528_v23, %v1527_v22  ;;  %v1544_v35 = vld [vmem:[%s4152_s5 + $0x378] sm:$0xff]  ;;  %v1885_v42 = vld [vmem:[%s4154_s7 + $0x8] sm:$0xff] }
 0x2f3   : > { %v1886_v28 = vld [vmem:[%s4154_s7 + $0x10] sm:$0xff]  ;;  %v1888_v37 = vld [vmem:[%s4154_s7 + $0x20] sm:$0xff]  ;;  %v1889_v46 = vld [vmem:[%s4154_s7 + $0x28] sm:$0xff] }
 0x2f4   : > { %v3888_v4 = vld [vmem:[#allocation6] sm:$0xff]  ;;  %v1890_v47 = vld [vmem:[%s4154_s7 + $0x30] sm:$0xff]  ;;  %v2573_v48 = vpack.c.bf16 %v1889_v46, %v1888_v37 }
 0x2f5   : > { %v1570_v10 = vrot.slane %v3888_v4, %v1569_v58  ;;  %v1578_v11 = vrot.slane %v3888_v4, %v1577_v60  ;;  %v1566_v12 = vrot.slane %v3888_v4, %v1565_v61  ;;  %v1574_v13 = vrot.slane %v3888_v4, %v1573_v62  ;;  %v1538_v60 = vld [vmem:[%s4152_s5 + $0x348] sm:$0xff]  ;;  %v1523_v61 = vld [vmem:[%s4152_s5 + $0x2d0] sm:$0xff]  ;;  %v1524_v62 = vld [vmem:[%s4152_s5 + $0x2d8] sm:$0xff] }
 0x2f6   : > { %v1586_v24 = vrot.slane %v3888_v4, %v1585_v7  ;;  %v1594_v25 = vrot.slane %v3888_v4, %v1593_v8  ;;  %v2550_v58 = vpack.c.bf16 %v1554_v51, %v1553_v50  ;;  %v2552_v2 = vpack.c.bf16 %v1538_v60, %v1537_v59  ;;  %v1539_v8 = vld [vmem:[%s4152_s5 + $0x350] sm:$0xff]  ;;  %v1891_v50 = vld [vmem:[%s4154_s7 + $0x38] sm:$0xff]  ;;  %v1561_v53 = vld [vmem:[%s4153_s6] sm:$0x1] }
 0x2f7   : > { %1667 = vmatprep.mubr.f32.mxu0 %v1570_v10  ;;  %1737 = vmatprep.mubr.f32.mxu1 %v1578_v11  ;;  %v2554_v7 = vpack.c.bf16 %v1556_v55, %v1555_v1  ;;  %v1526_v10 = vld [vmem:[%s4152_s5 + $0x2e8] sm:$0xff]  ;;  %v1557_v11 = vld [vmem:[%s4152_s5 + $0x3e0] sm:$0xff]  ;;  %v2556_v15 = vpack.c.bf16 %v1540_v9, %v1539_v8  ;;  %v1582_v41 = vrot.slane %v3888_v4, %v1581_v39 }
 0x2f8   : > { %1668 = vmatmul.mubr.f32.vlgmr.msra.gmra.mrb[8].mxu0 %v1566_v12  ;;  %1738 = vmatmul.mubr.f32.vlgmr.msra.gmra.mrb[4].mxu1 %v1574_v13  ;;  %v1558_v12 = vld [vmem:[%s4152_s5 + $0x3e8] sm:$0xff]  ;;  %v2526_v18 = vpack.c.bf16 %v1526_v10, %v1525_v54  ;;  %v2576_v51 = vpack.c.bf16 %v1891_v50, %v1890_v47 }
 0x2f9   : > { %2505 = vmatpush3.bf16.msra.mxu0 %v2504_v26  ;;  %2537 = vmatpush3.bf16.msra.mxu1 %v2536_v6  ;;  %v1508_v26 = vld [vmem:[%s4152_s5 + $0x258] sm:$0xff]  ;;  %v2522_v6 = vpack.c.bf16 %v1524_v62, %v1523_v61  ;;  %v2558_v19 = vpack.c.bf16 %v1558_v12, %v1557_v11 }
 0x2fa   : > { %1807 = vmatprep.mubr.f32.mxu0 %v1586_v24  ;;  %1877 = vmatprep.mubr.f32.mxu1 %v1594_v25  ;;  %v2524_v13 = vpack.c.bf16 %v1508_v26, %v1507_v3  ;;  %v1560_v24 = vld [vmem:[%s4152_s5 + $0x3f8] sm:$0xff]  ;;  %v2528_v25 = vpack.c.bf16 %v1510_v17, %v1509_v16 }
 0x2fb   : > { %2507 = vmatprep.subr.bf16.mxu0 %v2506_v20  ;;  %2539 = vmatprep.subr.bf16.mxu1 %v2538_v21  ;;  %v1541_v20 = vld [vmem:[%s4152_s5 + $0x360] sm:$0xff]  ;;  %v1542_v21 = vld [vmem:[%s4152_s5 + $0x368] sm:$0xff]  ;;  %v2562_v32 = vpack.c.bf16 %v1560_v24, %v1559_v14 }
 0x2fd   : > { %2509 = vmatpush3.bf16.msra.mxu0 %v2508_v27  ;;  %2541 = vmatpush3.bf16.msra.mxu1 %v2540_v29  ;;  %v2560_v27 = vpack.c.bf16 %v1542_v21, %v1541_v20  ;;  %v1511_v29 = vld [vmem:[%s4152_s5 + $0x270] sm:$0xff] }
 0x2fe   : > { %2511 = vmatprep.subr.bf16.mxu0 %v2510_v33  ;;  %2543 = vmatprep.subr.bf16.mxu1 %v2542_v34  ;;  %v1512_v33 = vld [vmem:[%s4152_s5 + $0x278] sm:$0xff]  ;;  %v1543_v34 = vld [vmem:[%s4152_s5 + $0x370] sm:$0xff] }
 0x2ff   : > { %v2532_v36 = vpack.c.bf16 %v1512_v33, %v1511_v29  ;;  %v2564_v38 = vpack.c.bf16 %v1544_v35, %v1543_v34 }
 0x301   : > { %2513 = vmatpush3.bf16.msra.mxu0 %v2512_v63  ;;  %2545 = vmatpush3.bf16.msra.mxu1 %v2544_v5  ;;  %v1590_v63 = vrot.slane %v3888_v4, %v1589_v40  ;;  %v1884_v5 = vld [vmem:[%s4154_s7] sm:$0xff]  ;;  %v1887_v4 = vld [vmem:[%s4154_s7 + $0x18] sm:$0xff] }
 0x302   : > { %2515 = vmatprep.subr.bf16.mxu0 %v2514_v44  ;;  %2547 = vmatprep.subr.bf16.mxu1 %v2546_v45  ;;  %v2567_v44 = vpack.c.bf16 %v1885_v42, %v1884_v5  ;;  %v2570_v45 = vpack.c.bf16 %v1887_v4, %v1886_v28 }
 0x305   : > { %2517 = vmatpush3.bf16.msra.mxu0 %v2516_v49  ;;  %2549 = vmatpush3.bf16.msra.mxu1 %v2548_v52 }
 0x306   : > { %2519 = vmatprep.subr.bf16.mxu0 %v2518_v57  ;;  %2551 = vmatprep.subr.bf16.mxu1 %v2550_v58 }
 0x309   : > { %2521 = vmatpush3.bf16.msra.mxu0 %v2520_v30  ;;  %2553 = vmatpush3.bf16.msra.mxu1 %v2552_v2 }
 0x30a   : > { %2523 = vmatprep.subr.bf16.mxu0 %v2522_v6  ;;  %2555 = vmatprep.subr.bf16.mxu1 %v2554_v7  ;;  %v1892_v7 = vld [vmem:[%s4155_s8] sm:$0x1] }
 0x30d   : > { %2525 = vmatpush3.bf16.msra.mxu0 %v2524_v13  ;;  %2557 = vmatpush3.bf16.msra.mxu1 %v2556_v15 }
 0x30e   : > { %2527 = vmatprep.subr.bf16.mxu0 %v2526_v18  ;;  %2559 = vmatprep.subr.bf16.mxu1 %v2558_v19 }
 0x311   : > { %2529 = vmatpush3.bf16.msra.mxu0 %v2528_v25  ;;  %2561 = vmatpush3.bf16.msra.mxu1 %v2560_v27 }
 0x312   : > { %2531 = vmatprep.subr.bf16.mxu0 %v2530_v31  ;;  %2563 = vmatprep.subr.bf16.mxu1 %v2562_v32 }
 0x315   : > { %2533 = vmatpush3.bf16.msra.mxu0 %v2532_v36  ;;  %2565 = vmatpush3.bf16.msra.mxu1 %v2564_v38 }
 0x316   : > { %2566 = vmatprep.subr.bf16.mxu0 %v2756_v43 }
 0x318   : > { %1808 = vmatmul.mubr.f32.vlgmr.msra.gmra.mrb[10].mxu0 %v1582_v41  ;;  %1878 = vmatmul.mubr.f32.vlgmr.msra.gmra.mrb[6].mxu1 %v1590_v63 }
 0x319   : > { %2568 = vmatpush3.bf16.msra.mxu0 %v2567_v44  ;;  %2243 = vmatprep.mubr.msk.f32.mxu0 %vm2757_vm12, %v2752_v0 }
 0x31a   : > { %2569 = vmatprep.subr.bf16.mxu0 %v2756_v43 }
 0x31d   : > { %2571 = vmatpush3.bf16.msra.mxu0 %v2570_v45 }
 0x31e   : > { %2572 = vmatprep.subr.bf16.mxu0 %v2756_v43 }
 0x321   : > { %2574 = vmatpush3.bf16.msra.mxu0 %v2573_v48 }
 0x322   : > { %2575 = vmatprep.subr.bf16.mxu0 %v2756_v43 }
 0x325   : > { %2577 = vmatpush3.bf16.msra.mxu0 %v2576_v51 }
 0x3cb   : > { %v2110_v49 = vpop.f32.mrb[8].mxu0  ;;  %v2145_v52 = vpop.f32.mrb[4].mxu1 }
 0x3cc   : > { %v2111_v56 = vpop.f32.mrb[9].mxu0  ;;  %v2146_v57 = vpop.f32.mrb[5].mxu1 }
 0x3cd   : > { %v2112_v58 = vadd.f32 %v2111_v56, %v2110_v49  ;;  %v2147_v59 = vadd.f32 %v2146_v57, %v2145_v52 }
 0x3cf   : > { %v1670_v60 = vadd.f32 %v2112_v58, %v1561_v53 }
 0x3d1   : > { %v1740_v61 = vadd.f32 %v2147_v59, %v1670_v60 }
 0x3eb   : > { %v2180_v62 = vpop.f32.mrb[10].mxu0  ;;  %v2215_v1 = vpop.f32.mrb[6].mxu1 }
 0x3ec   : > { %v2181_v55 = vpop.f32.mrb[11].mxu0  ;;  %v2216_v0 = vpop.f32.mrb[7].mxu1 }
 0x3ed   : > { %v2182_v30 = vadd.f32 %v2181_v55, %v2180_v62  ;;  %v2217_v2 = vadd.f32 %v2216_v0, %v2215_v1 }
 0x3ef   : > { %v1810_v3 = vadd.f32 %v2182_v30, %v1740_v61 }
 0x3f1   : > { %v1880_v26 = vadd.f32 %v2217_v2, %v1810_v3 }
 0x3f3   : > { %v1883_v6 = vmax.f32 %v1880_v26, 0.0 }
 0x3f5   : > { %2244 = vmatmul.mubr.msk.f32.vlgmr.msra.gmra.mrb[12].mxu0 %vm1893_vm13, %v1883_v6 }
 0x4c8   : > { %v1963_v8 = vpop.f32.mrb[12].mxu0 }
 0x4c9   : > { %v1964_v9 = vadd.f32 %v1963_v8, %v1892_v7  ;;  %v2245_v54 = vpop.f32.mrb[13].mxu0 }
 0x4cb   : > { %v1968_v10 = vsel %vm1967_vm14, %v1964_v9, -inf }
 0x4cc   : > { %1969 = vmax.xlane.f32.xlu0 %v1968_v10 }
 0x559   : > { %v1970_v11 = vpop.xlane.xlu0 %1969 }
 0x55a   : > { %v1971_v12 = vsub.f32 %v1964_v9, %v1970_v11 }
 0x55c   : > { %v1972_v13 = vmul.f32 1.442695, %v1971_v12 }
 0x55e   : > { %2647 = vpow2.f32 %v1972_v13 }
 0x568   : > { %v2648_v15 = vpop.eup %2647 }
 0x569   : > { %v1974_v16 = vsel %vm1967_vm14, %v2648_v15, 0.0 }
 0x56a   : > { %1975 = vadd.xlane.f32.xlu1 %v1974_v16 }
 0x5f7   : > { %v1976_v17 = vpop.xlane.xlu1 %1975 }
 0x5f8   : > { %2649 = vrcp.f32 %v1976_v17 }
 0x602   : > { %v2650_v18 = vpop.eup %2649 }
 0x603   : > { %v1978_v19 = vmul.f32 %v2650_v18, %v2648_v15 }
 0x605   : > { %1979 = vst.msk [vmem:[%s349_s27] sm:$0x1] %vm1967_vm14, %v1978_v19 }
 0x606   : > { %2694 = shalt.err (!%p2691_p2)
}
 0x607   : > { %s2695_s23 = scalar_lea.hbm %s4102_s29, 16  ;;  %s2699_s25 = scalar_lea.hbm %s4156_s9, 32 }
 0x608   : > { %p2696_p4 = scmp.ne.s32.totalorder %s4102_s29, %s2695_s23  ;;  %p2700_p9 = scmp.lt.u32.totalorder %s4102_s29, %s4156_s9 }
 0x609   : > { %p2701_p1 = scmp.lt.u32.totalorder %s2699_s25, %s2695_s23  ;;  %p2703_p6 = scmp.lt.u32.totalorder %s2695_s23, %s4102_s29 }
 0x60a   : > { %p2697_p5 = pnand %p2696_p4, %p4167_p11 }
 0x60b   : > { %p2702_p3 = por %p2701_p1, %p2700_p9 }
 0x60c   : > { %p2698_p7 = pneg %p2697_p5 }
 0x60d   : > { %p2704_p12 = por %p2703_p6, %p2702_p3 }
 0x60f   : > { %p2705_p13 = pnand %p2704_p12, %p2698_p7 }
 0x611   : > { %2708 = shalt.err (!%p2705_p13)
}
 0x612   : > { %2595 = dma.vmem_to_hbm [thread:$0]  (%p4167_p11), %s4104_s14, 16, %s4102_s29, %s1981_s11  }
 0x613 PF: > { %s2005_s16 = sand.u32 1, %s2735_s30   ;;  %p4168_p8 = scmp.ne.s32.totalorder %s4163_s21, 0 }
 0x614   : > { %p4169_p10 = scmp.ge.s32.totalorder %s2747_s12, 2  ;;  %s2006_s24 = scalar_lea.sflag [#allocation9], %s2005_s16 }
 0x616   : > { %p2602_p0 = pnand %p4169_p10, %p4168_p8 }
 0x618   : > { %2730 = dma.done.wait (!%p2602_p0), %s2006_s24, 16  }
 0x619   : > { %2732 = vsyncadd (!%p2602_p0), %s2006_s24, 4294967280  ;;  %s4170_s18 = sld [smem:[#allocation13_spill]]  ;;  %s4171_s11 = sld [smem:[#allocation14_spill]] }
 0x61a   : > { %p22_p2 = scmp.ge.s32.totalorder %s2834_s15, 4   ;;  %s4172_s30 = smov %s2739_s10 }
 0x61b   : > { %s4174_s12 = smov %s2834_s15 }
 0x61c   :  { %24 = sbr.rel (!%p22_p2) target bundleno = 5 (0x5), region = 103 }
 0x61f   : > { %s4173_s10 = smov %s4170_s18 }
 0x623   :  { %2010 = vsyncpa [#allocation8], 1 }
 0x624   :  { %2012 = vsyncpa [#allocation8 + $0x1], 1 }
 0x625   :  { %2013 = vsyncpa [#allocation9], 1 }
 0x626   :  { %2015 = vsyncpa [#allocation9 + $0x1], 1 }

</bundles_post_ra>
